<compile_context>
chip_gen: v7x
topology: tpu7x:2x2x1
jax: 0.10.0
libtpu: 0.0.40
codegen_flags: <defaults>
</compile_context>

<pallas_src>
import jax
import jax.numpy as jnp
from jax import lax
from jax.experimental import pallas as pl
from jax.experimental.pallas import tpu as pltpu

H = 16        # hidden width: em_node_mlp=[16], em_edge_mlp=[16], node_mlp=edge_mlp=[16,16,16]
NUM_FINE = 3  # number of GNBlock applications (weights shared across iterations)


def _round_up(v, m):
    return (v + m - 1) // m * m


def encoder_kernel(
    xT_ref, eT_ref, rowcol_ref, batch_ref,
    w_en_ref, w_ee_ref, we1_ref, we2_ref, we3_ref,
    wn1_ref, wn2_ref, wn3_ref, bias_ref,
    out_ref,
):
    f32 = jnp.float32
    relu = lambda v: jnp.maximum(v, 0.0)

    def mm(a, b):      # (m,k) @ (k,n)
        return lax.dot_general(a, b, (((1,), (0,)), ((), ())),
                               preferred_element_type=f32)

    def mm_nt(a, b):   # (m,k) @ (n,k)^T  (contract on the trailing dims)
        return lax.dot_general(a, b, (((1,), (1,)), ((), ())),
                               preferred_element_type=f32)

    Hh = w_en_ref.shape[0]          # hidden width (16)
    N = xT_ref.shape[1]             # padded node count
    E = eT_ref.shape[1]             # padded edge count
    B = out_ref.shape[0]            # number of graphs

    # ---- Build gather / scatter / pool operators in-kernel from int32 indices.
    # Padded (-1) indices never match the iota, so their one-hot rows/cols are
    # all zero (padded edges scatter nothing, padded nodes pool nothing).
    rc = rowcol_ref[...]                                                  # (2E, 1) int32
    G2 = (rc == lax.broadcasted_iota(jnp.int32, (2 * E, N), 1)).astype(f32)   # (2E, N)
    gcol = G2[E:, :]                                                      # (E, N) scatter_add operator
    bidx = batch_ref[...]                                                 # (1, N) int32
    P = (bidx == lax.broadcasted_iota(jnp.int32, (B, N), 0)).astype(f32)  # (B, N) pool operator

    # Packed biases (H, 8): slice once, pre-broadcast the loop-resident ones
    # (JAX does not CSE broadcast_in_dim -> hoist out of the unrolled loop).
    b = bias_ref[...]
    be1 = jnp.broadcast_to(b[:, 2:3], (Hh, E))
    be2 = jnp.broadcast_to(b[:, 3:4], (Hh, E))
    be3 = jnp.broadcast_to(b[:, 4:5], (Hh, E))
    bn1 = jnp.broadcast_to(b[:, 5:6], (Hh, N))
    bn2 = jnp.broadcast_to(b[:, 6:7], (Hh, N))
    bn3 = jnp.broadcast_to(b[:, 7:8], (Hh, N))

    we1 = we1_ref[...]   # (H, 3H) fused [src | dst | edge]
    we2 = we2_ref[...]   # (H, H)
    we3 = we3_ref[...]   # (H, H)
    wn1 = wn1_ref[...]   # (H, 2H) fused [x | agg]
    wn2 = wn2_ref[...]   # (H, H)
    wn3 = wn3_ref[...]   # (H, H)

    # ---- Embed layer (EmbedNodeModel / EmbedEdgeModel): Linear + ReLU (dropout p=0) ----
    x = relu(mm(w_en_ref[...], xT_ref[...]) + b[:, 0:1])   # (H, N)
    e = relu(mm(w_ee_ref[...], eT_ref[...]) + b[:, 1:2])   # (H, E)

    pooled = []
    for _ in range(NUM_FINE):
        # ---- EdgeModel: MLP(cat([x[row], x[col], edge_attr])) ----
        # Fused src+dst gather: one (H,N)x(2E,N)^T matmul, then aligned lane slices.
        srcdst = mm_nt(x, G2)                                     # (H, 2E)
        ein = jnp.concatenate([srcdst[:, :E], srcdst[:, E:], e], axis=0)   # (3H, E)
        h = relu(mm(we1, ein) + be1)
        h = relu(mm(we2, h) + be2)
        e = relu(mm(we3, h) + be3)                                # (H, E)

        # ---- NodeModel: MLP(cat([x, scatter_add(edge_attr, col)])) ----
        agg = mm(e, gcol)                                         # (H, N) scatter_add over col
        nin = jnp.concatenate([x, agg], axis=0)                   # (2H, N)
        g = relu(mm(wn1, nin) + bn1)
        g = relu(mm(wn2, g) + bn2)
        x = relu(mm(wn3, g) + bn3)                                # (H, N)

        # ---- global_add_pool(x, batch) ----
        pooled.append(mm_nt(P, x))                                # (B, H)

    # Single full-width store of the concatenated representation.
    out_ref[...] = jnp.concatenate(pooled, axis=1)                # (B, NUM_FINE*H)


def _vmem_limit_bytes():
    """~3/4 of physical VMEM, capped at 112 MiB (96 MiB on v5e/v6e, 48 MiB on v7x)."""
    cap = None
    try:
        info = pltpu.get_tpu_info()
        for name in ("vmem_capacity_bytes", "vmem_bytes", "vmem_size_bytes"):
            cap = getattr(info, name, None)
            if cap:
                break
    except Exception:
        cap = None
    if not cap:
        cap = 64 * 1024 * 1024   # conservative fallback (v7x per-TensorCore)
    return int(min((int(cap) * 3) // 4, 112 * 1024 * 1024))


def encoder_forward(x, edge_attr, edge_index, batch, params, num_graphs):
    N, F_n = x.shape
    E, F_e = edge_attr.shape
    B = int(num_graphs)
    row, col = edge_index[0], edge_index[1]
    (w_en, b_en, w_ee, b_ee, we1, be1, we2, be2, we3, be3,
     wn1, bn1, wn2, bn2, wn3, bn3) = params

    # Pad node / edge dims to 128 multiples so in-kernel lane slices are aligned.
    # Padded slots get index -1 -> all-zero one-hot rows (masked out exactly).
    N_pad = _round_up(max(N, 1), 128)
    E_pad = _round_up(max(E, 1), 128)

    xT = jnp.zeros((F_n, N_pad), jnp.float32).at[:, :N].set(x.T)
    eT = jnp.zeros((F_e, E_pad), jnp.float32).at[:, :E].set(edge_attr.T)

    row_p = jnp.full((E_pad,), -1, jnp.int32).at[:E].set(row.astype(jnp.int32))
    col_p = jnp.full((E_pad,), -1, jnp.int32).at[:E].set(col.astype(jnp.int32))
    rowcol = jnp.concatenate([row_p, col_p], axis=0).reshape(2 * E_pad, 1)        # (2E, 1)
    batch_p = jnp.full((1, N_pad), -1, jnp.int32).at[0, :N].set(batch.astype(jnp.int32))  # (1, N)

    # Feature-major (transposed) weights; all 8 biases packed into one (H, 8) DMA.
    wts = tuple(w.T for w in (w_en, w_ee, we1, we2, we3, wn1, wn2, wn3))
    bias_pack = jnp.concatenate(
        [bb.reshape(-1, 1) for bb in (b_en, b_ee, be1, be2, be3, bn1, bn2, bn3)],
        axis=1)                                                                   # (H, 8)

    args = (xT, eT, rowcol, batch_p) + wts + (bias_pack,)
    vspec = pl.BlockSpec(memory_space=pltpu.MemorySpace.VMEM)

    out = pl.pallas_call(
        encoder_kernel,
        out_shape=jax.ShapeDtypeStruct((B, NUM_FINE * H), jnp.float32),
        in_specs=[vspec] * len(args),
        out_specs=vspec,
        compiler_params=pltpu.CompilerParams(vmem_limit_bytes=_vmem_limit_bytes()),
    )(*args)
    # forward returns (encoder_out_mu, inpresentation) which are the same tensor
    return out, out


def init_params(key, input_dim_n, input_dim_e):
    ks = jax.random.split(key, 8)

    def lin(k, fin, fout):
        kw, kb = jax.random.split(k)
        w = jax.random.normal(kw, (fin, fout), jnp.float32) * (1.0 / jnp.sqrt(fin))
        b = jax.random.normal(kb, (1, fout), jnp.float32) * 0.1
        return w, b

    # Embed MLPs
    w_en, b_en = lin(ks[0], input_dim_n, H)
    w_ee, b_ee = lin(ks[1], input_dim_e, H)
    # GNBlock edge MLP: layer1 input = H(src)+H(dest)+H(edge) = 48 (kept fused)
    we1, be1 = lin(ks[2], 3 * H, H)
    we2, be2 = lin(ks[3], H, H)
    we3, be3 = lin(ks[4], H, H)
    # GNBlock node MLP: layer1 input = H(x)+H(agg) = 32 (kept fused)
    wn1, bn1 = lin(ks[5], 2 * H, H)
    wn2, bn2 = lin(ks[6], H, H)
    wn3, bn3 = lin(ks[7], H, H)

    return (w_en, b_en, w_ee, b_ee, we1, be1, we2, be2, we3, be3,
            wn1, bn1, wn2, bn2, wn3, bn3)


def reference_forward(x, edge_attr, edge_index, batch, params, num_graphs):
    """Pure-JAX reference mirroring the PyTorch Encoder.forward semantics."""
    (w_en, b_en, w_ee, b_ee, we1, be1, we2, be2, we3, be3,
     wn1, bn1, wn2, bn2, wn3, bn3) = params
    relu = jax.nn.relu
    row, col = edge_index[0], edge_index[1]

    x = relu(x @ w_en + b_en)
    e = relu(edge_attr @ w_ee + b_ee)

    outs = []
    for _ in range(NUM_FINE):
        ein = jnp.concatenate([x[row], x[col], e], axis=1)
        h = relu(ein @ we1 + be1)
        h = relu(h @ we2 + be2)
        e = relu(h @ we3 + be3)
        agg = jax.ops.segment_sum(e, col, num_segments=x.shape[0])
        nin = jnp.concatenate([x, agg], axis=1)
        g = relu(nin @ wn1 + bn1)
        g = relu(g @ wn2 + bn2)
        x = relu(g @ wn3 + bn3)
        outs.append(jax.ops.segment_sum(x, batch, num_segments=num_graphs))
    return jnp.concatenate(outs, axis=-1)


if __name__ == "__main__":
    key = jax.random.PRNGKey(0)
    k_x, k_e, k_ei, k_p = jax.random.split(key, 4)

    N, E, B = 24, 40, 2               # nodes, edges, graphs
    INPUT_DIM_N, INPUT_DIM_E = 16, 8  # node / edge feature dims

    x = jax.random.normal(k_x, (N, INPUT_DIM_N), jnp.float32)
    edge_attr = jax.random.normal(k_e, (E, INPUT_DIM_E), jnp.float32)
    edge_index = jax.random.randint(k_ei, (2, E), 0, N)
    batch = jnp.concatenate(
        [jnp.zeros(N // 2, jnp.int32), jnp.ones(N - N // 2, jnp.int32)])

    params = init_params(k_p, INPUT_DIM_N, INPUT_DIM_E)

    out_mu, inrep = encoder_forward(x, edge_attr, edge_index, batch, params, B)
    jax.block_until_ready(out_mu)

    ref = reference_forward(x, edge_attr, edge_index, batch, params, B)
    assert out_mu.shape == (B, NUM_FINE * H)
    assert jnp.allclose(out_mu, ref, atol=1e-4, rtol=1e-4)

    print("KERNEL_OK")
</pallas_src>

<mosaic_0001>
module attributes {stable_mosaic.version = 11 : i64} {
  func.func @encoder_kernel(%arg0: memref<16x128xf32, #tpu.memory_space<vmem>>, %arg1: memref<8x128xf32, #tpu.memory_space<vmem>>, %arg2: memref<256x1xi32, #tpu.memory_space<vmem>>, %arg3: memref<1x128xi32, #tpu.memory_space<vmem>>, %arg4: memref<16x16xf32, #tpu.memory_space<vmem>>, %arg5: memref<16x8xf32, #tpu.memory_space<vmem>>, %arg6: memref<16x48xf32, #tpu.memory_space<vmem>>, %arg7: memref<16x16xf32, #tpu.memory_space<vmem>>, %arg8: memref<16x16xf32, #tpu.memory_space<vmem>>, %arg9: memref<16x32xf32, #tpu.memory_space<vmem>>, %arg10: memref<16x16xf32, #tpu.memory_space<vmem>>, %arg11: memref<16x16xf32, #tpu.memory_space<vmem>>, %arg12: memref<16x8xf32, #tpu.memory_space<vmem>>, %arg13: memref<2x48xf32, #tpu.memory_space<vmem>>) attributes {dimension_semantics = [], scalar_prefetch = 0 : i64, scratch_operands = 0 : i64, tpu.core_type = #tpu.core_type<tc>} {
    %c0 = arith.constant 0 : index
    %c0_0 = arith.constant 0 : index
    %0 = vector.load %arg2[%c0, %c0_0] : memref<256x1xi32, #tpu.memory_space<vmem>>, vector<256x1xi32>
    %1 = tpu.iota {dimensions = array<i32: 1>} : vector<256x128xi32>
    %2 = vector.broadcast %0 : vector<256x1xi32> to vector<256x128xi32>
    %3 = arith.cmpi eq, %2, %1 : vector<256x128xi32>
    %4 = arith.extui %3 : vector<256x128xi1> to vector<256x128xi32>
    %5 = arith.sitofp %4 : vector<256x128xi32> to vector<256x128xf32>
    %6 = vector.extract_strided_slice %5 {offsets = [128, 0], sizes = [128, 128], strides = [1, 1]} : vector<256x128xf32> to vector<128x128xf32>
    %c0_1 = arith.constant 0 : index
    %c0_2 = arith.constant 0 : index
    %7 = vector.load %arg3[%c0_1, %c0_2] : memref<1x128xi32, #tpu.memory_space<vmem>>, vector<1x128xi32>
    %8 = tpu.iota {dimensions = array<i32: 0>} : vector<2x128xi32>
    %9 = vector.broadcast %7 : vector<1x128xi32> to vector<2x128xi32>
    %10 = arith.cmpi eq, %9, %8 : vector<2x128xi32>
    %11 = arith.extui %10 : vector<2x128xi1> to vector<2x128xi32>
    %12 = arith.sitofp %11 : vector<2x128xi32> to vector<2x128xf32>
    %c0_3 = arith.constant 0 : index
    %c0_4 = arith.constant 0 : index
    %13 = vector.load %arg12[%c0_3, %c0_4] : memref<16x8xf32, #tpu.memory_space<vmem>>, vector<16x8xf32>
    %14 = vector.extract_strided_slice %13 {offsets = [0, 2], sizes = [16, 1], strides = [1, 1]} : vector<16x8xf32> to vector<16x1xf32>
    %15 = vector.shape_cast %14 : vector<16x1xf32> to vector<16x1xf32>
    %16 = vector.broadcast %15 : vector<16x1xf32> to vector<16x128xf32>
    %17 = vector.extract_strided_slice %13 {offsets = [0, 3], sizes = [16, 1], strides = [1, 1]} : vector<16x8xf32> to vector<16x1xf32>
    %18 = vector.shape_cast %17 : vector<16x1xf32> to vector<16x1xf32>
    %19 = vector.broadcast %18 : vector<16x1xf32> to vector<16x128xf32>
    %20 = vector.extract_strided_slice %13 {offsets = [0, 4], sizes = [16, 1], strides = [1, 1]} : vector<16x8xf32> to vector<16x1xf32>
    %21 = vector.shape_cast %20 : vector<16x1xf32> to vector<16x1xf32>
    %22 = vector.broadcast %21 : vector<16x1xf32> to vector<16x128xf32>
    %23 = vector.extract_strided_slice %13 {offsets = [0, 5], sizes = [16, 1], strides = [1, 1]} : vector<16x8xf32> to vector<16x1xf32>
    %24 = vector.shape_cast %23 : vector<16x1xf32> to vector<16x1xf32>
    %25 = vector.broadcast %24 : vector<16x1xf32> to vector<16x128xf32>
    %26 = vector.extract_strided_slice %13 {offsets = [0, 6], sizes = [16, 1], strides = [1, 1]} : vector<16x8xf32> to vector<16x1xf32>
    %27 = vector.shape_cast %26 : vector<16x1xf32> to vector<16x1xf32>
    %28 = vector.broadcast %27 : vector<16x1xf32> to vector<16x128xf32>
    %29 = vector.extract_strided_slice %13 {offsets = [0, 7], sizes = [16, 1], strides = [1, 1]} : vector<16x8xf32> to vector<16x1xf32>
    %30 = vector.shape_cast %29 : vector<16x1xf32> to vector<16x1xf32>
    %31 = vector.broadcast %30 : vector<16x1xf32> to vector<16x128xf32>
    %c0_5 = arith.constant 0 : index
    %c0_6 = arith.constant 0 : index
    %32 = vector.load %arg6[%c0_5, %c0_6] : memref<16x48xf32, #tpu.memory_space<vmem>>, vector<16x48xf32>
    %c0_7 = arith.constant 0 : index
    %c0_8 = arith.constant 0 : index
    %33 = vector.load %arg7[%c0_7, %c0_8] : memref<16x16xf32, #tpu.memory_space<vmem>>, vector<16x16xf32>
    %c0_9 = arith.constant 0 : index
    %c0_10 = arith.constant 0 : index
    %34 = vector.load %arg8[%c0_9, %c0_10] : memref<16x16xf32, #tpu.memory_space<vmem>>, vector<16x16xf32>
    %c0_11 = arith.constant 0 : index
    %c0_12 = arith.constant 0 : index
    %35 = vector.load %arg9[%c0_11, %c0_12] : memref<16x32xf32, #tpu.memory_space<vmem>>, vector<16x32xf32>
    %c0_13 = arith.constant 0 : index
    %c0_14 = arith.constant 0 : index
    %36 = vector.load %arg10[%c0_13, %c0_14] : memref<16x16xf32, #tpu.memory_space<vmem>>, vector<16x16xf32>
    %c0_15 = arith.constant 0 : index
    %c0_16 = arith.constant 0 : index
    %37 = vector.load %arg11[%c0_15, %c0_16] : memref<16x16xf32, #tpu.memory_space<vmem>>, vector<16x16xf32>
    %c0_17 = arith.constant 0 : index
    %c0_18 = arith.constant 0 : index
    %38 = vector.load %arg4[%c0_17, %c0_18] : memref<16x16xf32, #tpu.memory_space<vmem>>, vector<16x16xf32>
    %c0_19 = arith.constant 0 : index
    %c0_20 = arith.constant 0 : index
    %39 = vector.load %arg0[%c0_19, %c0_20] : memref<16x128xf32, #tpu.memory_space<vmem>>, vector<16x128xf32>
    %cst = arith.constant dense<0.000000e+00> : vector<16x128xf32>
    %40 = tpu.matmul %38, %39, %cst {dimension_numbers = #tpu.dot_dimension_numbers<[1], [0], [0], [1], [0, 0, 1, 1], [], []>} : vector<16x16xf32>, vector<16x128xf32>, vector<16x128xf32> -> vector<16x128xf32>
    %41 = vector.extract_strided_slice %13 {offsets = [0, 0], sizes = [16, 1], strides = [1, 1]} : vector<16x8xf32> to vector<16x1xf32>
    %42 = vector.broadcast %41 : vector<16x1xf32> to vector<16x128xf32>
    %43 = arith.addf %40, %42 : vector<16x128xf32>
    %cst_21 = arith.constant 0.000000e+00 : f32
    %44 = vector.broadcast %cst_21 : f32 to vector<16x128xf32>
    %45 = arith.maximumf %43, %44 : vector<16x128xf32>
    %c0_22 = arith.constant 0 : index
    %c0_23 = arith.constant 0 : index
    %46 = vector.load %arg5[%c0_22, %c0_23] : memref<16x8xf32, #tpu.memory_space<vmem>>, vector<16x8xf32>
    %c0_24 = arith.constant 0 : index
    %c0_25 = arith.constant 0 : index
    %47 = vector.load %arg1[%c0_24, %c0_25] : memref<8x128xf32, #tpu.memory_space<vmem>>, vector<8x128xf32>
    %cst_26 = arith.constant dense<0.000000e+00> : vector<16x128xf32>
    %48 = tpu.matmul %46, %47, %cst_26 {dimension_numbers = #tpu.dot_dimension_numbers<[1], [0], [0], [1], [0, 0, 1, 1], [], []>} : vector<16x8xf32>, vector<8x128xf32>, vector<16x128xf32> -> vector<16x128xf32>
    %49 = vector.extract_strided_slice %13 {offsets = [0, 1], sizes = [16, 1], strides = [1, 1]} : vector<16x8xf32> to vector<16x1xf32>
    %50 = vector.broadcast %49 : vector<16x1xf32> to vector<16x128xf32>
    %51 = arith.addf %48, %50 : vector<16x128xf32>
    %cst_27 = arith.constant 0.000000e+00 : f32
    %52 = vector.broadcast %cst_27 : f32 to vector<16x128xf32>
    %53 = arith.maximumf %51, %52 : vector<16x128xf32>
    %cst_28 = arith.constant dense<0.000000e+00> : vector<16x256xf32>
    %54 = tpu.matmul %45, %5, %cst_28 {dimension_numbers = #tpu.dot_dimension_numbers<[1], [1], [0], [0], [0, 0, 1, 0], [], []>} : vector<16x128xf32>, vector<256x128xf32>, vector<16x256xf32> -> vector<16x256xf32>
    %55 = vector.extract_strided_slice %54 {offsets = [0, 0], sizes = [16, 128], strides = [1, 1]} : vector<16x256xf32> to vector<16x128xf32>
    %56 = vector.extract_strided_slice %54 {offsets = [0, 128], sizes = [16, 128], strides = [1, 1]} : vector<16x256xf32> to vector<16x128xf32>
    %57 = tpu.concatenate %55, %56, %53 in 0 : vector<16x128xf32>, vector<16x128xf32>, vector<16x128xf32> -> vector<48x128xf32>
    %cst_29 = arith.constant dense<0.000000e+00> : vector<16x128xf32>
    %58 = tpu.matmul %32, %57, %cst_29 {dimension_numbers = #tpu.dot_dimension_numbers<[1], [0], [0], [1], [0, 0, 1, 1], [], []>} : vector<16x48xf32>, vector<48x128xf32>, vector<16x128xf32> -> vector<16x128xf32>
    %59 = arith.addf %58, %16 : vector<16x128xf32>
    %cst_30 = arith.constant 0.000000e+00 : f32
    %60 = vector.broadcast %cst_30 : f32 to vector<16x128xf32>
    %61 = arith.maximumf %59, %60 : vector<16x128xf32>
    %cst_31 = arith.constant dense<0.000000e+00> : vector<16x128xf32>
    %62 = tpu.matmul %33, %61, %cst_31 {dimension_numbers = #tpu.dot_dimension_numbers<[1], [0], [0], [1], [0, 0, 1, 1], [], []>} : vector<16x16xf32>, vector<16x128xf32>, vector<16x128xf32> -> vector<16x128xf32>
    %63 = arith.addf %62, %19 : vector<16x128xf32>
    %cst_32 = arith.constant 0.000000e+00 : f32
    %64 = vector.broadcast %cst_32 : f32 to vector<16x128xf32>
    %65 = arith.maximumf %63, %64 : vector<16x128xf32>
    %cst_33 = arith.constant dense<0.000000e+00> : vector<16x128xf32>
    %66 = tpu.matmul %34, %65, %cst_33 {dimension_numbers = #tpu.dot_dimension_numbers<[1], [0], [0], [1], [0, 0, 1, 1], [], []>} : vector<16x16xf32>, vector<16x128xf32>, vector<16x128xf32> -> vector<16x128xf32>
    %67 = arith.addf %66, %22 : vector<16x128xf32>
    %cst_34 = arith.constant 0.000000e+00 : f32
    %68 = vector.broadcast %cst_34 : f32 to vector<16x128xf32>
    %69 = arith.maximumf %67, %68 : vector<16x128xf32>
    %cst_35 = arith.constant dense<0.000000e+00> : vector<16x128xf32>
    %70 = tpu.matmul %69, %6, %cst_35 {dimension_numbers = #tpu.dot_dimension_numbers<[1], [0], [0], [1], [0, 0, 1, 1], [], []>} : vector<16x128xf32>, vector<128x128xf32>, vector<16x128xf32> -> vector<16x128xf32>
    %71 = tpu.concatenate %45, %70 in 0 : vector<16x128xf32>, vector<16x128xf32> -> vector<32x128xf32>
    %cst_36 = arith.constant dense<0.000000e+00> : vector<16x128xf32>
    %72 = tpu.matmul %35, %71, %cst_36 {dimension_numbers = #tpu.dot_dimension_numbers<[1], [0], [0], [1], [0, 0, 1, 1], [], []>} : vector<16x32xf32>, vector<32x128xf32>, vector<16x128xf32> -> vector<16x128xf32>
    %73 = arith.addf %72, %25 : vector<16x128xf32>
    %cst_37 = arith.constant 0.000000e+00 : f32
    %74 = vector.broadcast %cst_37 : f32 to vector<16x128xf32>
    %75 = arith.maximumf %73, %74 : vector<16x128xf32>
    %cst_38 = arith.constant dense<0.000000e+00> : vector<16x128xf32>
    %76 = tpu.matmul %36, %75, %cst_38 {dimension_numbers = #tpu.dot_dimension_numbers<[1], [0], [0], [1], [0, 0, 1, 1], [], []>} : vector<16x16xf32>, vector<16x128xf32>, vector<16x128xf32> -> vector<16x128xf32>
    %77 = arith.addf %76, %28 : vector<16x128xf32>
    %cst_39 = arith.constant 0.000000e+00 : f32
    %78 = vector.broadcast %cst_39 : f32 to vector<16x128xf32>
    %79 = arith.maximumf %77, %78 : vector<16x128xf32>
    %cst_40 = arith.constant dense<0.000000e+00> : vector<16x128xf32>
    %80 = tpu.matmul %37, %79, %cst_40 {dimension_numbers = #tpu.dot_dimension_numbers<[1], [0], [0], [1], [0, 0, 1, 1], [], []>} : vector<16x16xf32>, vector<16x128xf32>, vector<16x128xf32> -> vector<16x128xf32>
    %81 = arith.addf %80, %31 : vector<16x128xf32>
    %cst_41 = arith.constant 0.000000e+00 : f32
    %82 = vector.broadcast %cst_41 : f32 to vector<16x128xf32>
    %83 = arith.maximumf %81, %82 : vector<16x128xf32>
    %cst_42 = arith.constant dense<0.000000e+00> : vector<2x16xf32>
    %84 = tpu.matmul %12, %83, %cst_42 {dimension_numbers = #tpu.dot_dimension_numbers<[1], [1], [0], [0], [0, 0, 1, 0], [], []>} : vector<2x128xf32>, vector<16x128xf32>, vector<2x16xf32> -> vector<2x16xf32>
    %cst_43 = arith.constant dense<0.000000e+00> : vector<16x256xf32>
    %85 = tpu.matmul %83, %5, %cst_43 {dimension_numbers = #tpu.dot_dimension_numbers<[1], [1], [0], [0], [0, 0, 1, 0], [], []>} : vector<16x128xf32>, vector<256x128xf32>, vector<16x256xf32> -> vector<16x256xf32>
    %86 = vector.extract_strided_slice %85 {offsets = [0, 0], sizes = [16, 128], strides = [1, 1]} : vector<16x256xf32> to vector<16x128xf32>
    %87 = vector.extract_strided_slice %85 {offsets = [0, 128], sizes = [16, 128], strides = [1, 1]} : vector<16x256xf32> to vector<16x128xf32>
    %88 = tpu.concatenate %86, %87, %69 in 0 : vector<16x128xf32>, vector<16x128xf32>, vector<16x128xf32> -> vector<48x128xf32>
    %cst_44 = arith.constant dense<0.000000e+00> : vector<16x128xf32>
    %89 = tpu.matmul %32, %88, %cst_44 {dimension_numbers = #tpu.dot_dimension_numbers<[1], [0], [0], [1], [0, 0, 1, 1], [], []>} : vector<16x48xf32>, vector<48x128xf32>, vector<16x128xf32> -> vector<16x128xf32>
    %90 = arith.addf %89, %16 : vector<16x128xf32>
    %cst_45 = arith.constant 0.000000e+00 : f32
    %91 = vector.broadcast %cst_45 : f32 to vector<16x128xf32>
    %92 = arith.maximumf %90, %91 : vector<16x128xf32>
    %cst_46 = arith.constant dense<0.000000e+00> : vector<16x128xf32>
    %93 = tpu.matmul %33, %92, %cst_46 {dimension_numbers = #tpu.dot_dimension_numbers<[1], [0], [0], [1], [0, 0, 1, 1], [], []>} : vector<16x16xf32>, vector<16x128xf32>, vector<16x128xf32> -> vector<16x128xf32>
    %94 = arith.addf %93, %19 : vector<16x128xf32>
    %cst_47 = arith.constant 0.000000e+00 : f32
    %95 = vector.broadcast %cst_47 : f32 to vector<16x128xf32>
    %96 = arith.maximumf %94, %95 : vector<16x128xf32>
    %cst_48 = arith.constant dense<0.000000e+00> : vector<16x128xf32>
    %97 = tpu.matmul %34, %96, %cst_48 {dimension_numbers = #tpu.dot_dimension_numbers<[1], [0], [0], [1], [0, 0, 1, 1], [], []>} : vector<16x16xf32>, vector<16x128xf32>, vector<16x128xf32> -> vector<16x128xf32>
    %98 = arith.addf %97, %22 : vector<16x128xf32>
    %cst_49 = arith.constant 0.000000e+00 : f32
    %99 = vector.broadcast %cst_49 : f32 to vector<16x128xf32>
    %100 = arith.maximumf %98, %99 : vector<16x128xf32>
    %cst_50 = arith.constant dense<0.000000e+00> : vector<16x128xf32>
    %101 = tpu.matmul %100, %6, %cst_50 {dimension_numbers = #tpu.dot_dimension_numbers<[1], [0], [0], [1], [0, 0, 1, 1], [], []>} : vector<16x128xf32>, vector<128x128xf32>, vector<16x128xf32> -> vector<16x128xf32>
    %102 = tpu.concatenate %83, %101 in 0 : vector<16x128xf32>, vector<16x128xf32> -> vector<32x128xf32>
    %cst_51 = arith.constant dense<0.000000e+00> : vector<16x128xf32>
    %103 = tpu.matmul %35, %102, %cst_51 {dimension_numbers = #tpu.dot_dimension_numbers<[1], [0], [0], [1], [0, 0, 1, 1], [], []>} : vector<16x32xf32>, vector<32x128xf32>, vector<16x128xf32> -> vector<16x128xf32>
    %104 = arith.addf %103, %25 : vector<16x128xf32>
    %cst_52 = arith.constant 0.000000e+00 : f32
    %105 = vector.broadcast %cst_52 : f32 to vector<16x128xf32>
    %106 = arith.maximumf %104, %105 : vector<16x128xf32>
    %cst_53 = arith.constant dense<0.000000e+00> : vector<16x128xf32>
    %107 = tpu.matmul %36, %106, %cst_53 {dimension_numbers = #tpu.dot_dimension_numbers<[1], [0], [0], [1], [0, 0, 1, 1], [], []>} : vector<16x16xf32>, vector<16x128xf32>, vector<16x128xf32> -> vector<16x128xf32>
    %108 = arith.addf %107, %28 : vector<16x128xf32>
    %cst_54 = arith.constant 0.000000e+00 : f32
    %109 = vector.broadcast %cst_54 : f32 to vector<16x128xf32>
    %110 = arith.maximumf %108, %109 : vector<16x128xf32>
    %cst_55 = arith.constant dense<0.000000e+00> : vector<16x128xf32>
    %111 = tpu.matmul %37, %110, %cst_55 {dimension_numbers = #tpu.dot_dimension_numbers<[1], [0], [0], [1], [0, 0, 1, 1], [], []>} : vector<16x16xf32>, vector<16x128xf32>, vector<16x128xf32> -> vector<16x128xf32>
    %112 = arith.addf %111, %31 : vector<16x128xf32>
    %cst_56 = arith.constant 0.000000e+00 : f32
    %113 = vector.broadcast %cst_56 : f32 to vector<16x128xf32>
    %114 = arith.maximumf %112, %113 : vector<16x128xf32>
    %cst_57 = arith.constant dense<0.000000e+00> : vector<2x16xf32>
    %115 = tpu.matmul %12, %114, %cst_57 {dimension_numbers = #tpu.dot_dimension_numbers<[1], [1], [0], [0], [0, 0, 1, 0], [], []>} : vector<2x128xf32>, vector<16x128xf32>, vector<2x16xf32> -> vector<2x16xf32>
    %cst_58 = arith.constant dense<0.000000e+00> : vector<16x256xf32>
    %116 = tpu.matmul %114, %5, %cst_58 {dimension_numbers = #tpu.dot_dimension_numbers<[1], [1], [0], [0], [0, 0, 1, 0], [], []>} : vector<16x128xf32>, vector<256x128xf32>, vector<16x256xf32> -> vector<16x256xf32>
    %117 = vector.extract_strided_slice %116 {offsets = [0, 0], sizes = [16, 128], strides = [1, 1]} : vector<16x256xf32> to vector<16x128xf32>
    %118 = vector.extract_strided_slice %116 {offsets = [0, 128], sizes = [16, 128], strides = [1, 1]} : vector<16x256xf32> to vector<16x128xf32>
    %119 = tpu.concatenate %117, %118, %100 in 0 : vector<16x128xf32>, vector<16x128xf32>, vector<16x128xf32> -> vector<48x128xf32>
    %cst_59 = arith.constant dense<0.000000e+00> : vector<16x128xf32>
    %120 = tpu.matmul %32, %119, %cst_59 {dimension_numbers = #tpu.dot_dimension_numbers<[1], [0], [0], [1], [0, 0, 1, 1], [], []>} : vector<16x48xf32>, vector<48x128xf32>, vector<16x128xf32> -> vector<16x128xf32>
    %121 = arith.addf %120, %16 : vector<16x128xf32>
    %cst_60 = arith.constant 0.000000e+00 : f32
    %122 = vector.broadcast %cst_60 : f32 to vector<16x128xf32>
    %123 = arith.maximumf %121, %122 : vector<16x128xf32>
    %cst_61 = arith.constant dense<0.000000e+00> : vector<16x128xf32>
    %124 = tpu.matmul %33, %123, %cst_61 {dimension_numbers = #tpu.dot_dimension_numbers<[1], [0], [0], [1], [0, 0, 1, 1], [], []>} : vector<16x16xf32>, vector<16x128xf32>, vector<16x128xf32> -> vector<16x128xf32>
    %125 = arith.addf %124, %19 : vector<16x128xf32>
    %cst_62 = arith.constant 0.000000e+00 : f32
    %126 = vector.broadcast %cst_62 : f32 to vector<16x128xf32>
    %127 = arith.maximumf %125, %126 : vector<16x128xf32>
    %cst_63 = arith.constant dense<0.000000e+00> : vector<16x128xf32>
    %128 = tpu.matmul %34, %127, %cst_63 {dimension_numbers = #tpu.dot_dimension_numbers<[1], [0], [0], [1], [0, 0, 1, 1], [], []>} : vector<16x16xf32>, vector<16x128xf32>, vector<16x128xf32> -> vector<16x128xf32>
    %129 = arith.addf %128, %22 : vector<16x128xf32>
    %cst_64 = arith.constant 0.000000e+00 : f32
    %130 = vector.broadcast %cst_64 : f32 to vector<16x128xf32>
    %131 = arith.maximumf %129, %130 : vector<16x128xf32>
    %cst_65 = arith.constant dense<0.000000e+00> : vector<16x128xf32>
    %132 = tpu.matmul %131, %6, %cst_65 {dimension_numbers = #tpu.dot_dimension_numbers<[1], [0], [0], [1], [0, 0, 1, 1], [], []>} : vector<16x128xf32>, vector<128x128xf32>, vector<16x128xf32> -> vector<16x128xf32>
    %133 = tpu.concatenate %114, %132 in 0 : vector<16x128xf32>, vector<16x128xf32> -> vector<32x128xf32>
    %cst_66 = arith.constant dense<0.000000e+00> : vector<16x128xf32>
    %134 = tpu.matmul %35, %133, %cst_66 {dimension_numbers = #tpu.dot_dimension_numbers<[1], [0], [0], [1], [0, 0, 1, 1], [], []>} : vector<16x32xf32>, vector<32x128xf32>, vector<16x128xf32> -> vector<16x128xf32>
    %135 = arith.addf %134, %25 : vector<16x128xf32>
    %cst_67 = arith.constant 0.000000e+00 : f32
    %136 = vector.broadcast %cst_67 : f32 to vector<16x128xf32>
    %137 = arith.maximumf %135, %136 : vector<16x128xf32>
    %cst_68 = arith.constant dense<0.000000e+00> : vector<16x128xf32>
    %138 = tpu.matmul %36, %137, %cst_68 {dimension_numbers = #tpu.dot_dimension_numbers<[1], [0], [0], [1], [0, 0, 1, 1], [], []>} : vector<16x16xf32>, vector<16x128xf32>, vector<16x128xf32> -> vector<16x128xf32>
    %139 = arith.addf %138, %28 : vector<16x128xf32>
    %cst_69 = arith.constant 0.000000e+00 : f32
    %140 = vector.broadcast %cst_69 : f32 to vector<16x128xf32>
    %141 = arith.maximumf %139, %140 : vector<16x128xf32>
    %cst_70 = arith.constant dense<0.000000e+00> : vector<16x128xf32>
    %142 = tpu.matmul %37, %141, %cst_70 {dimension_numbers = #tpu.dot_dimension_numbers<[1], [0], [0], [1], [0, 0, 1, 1], [], []>} : vector<16x16xf32>, vector<16x128xf32>, vector<16x128xf32> -> vector<16x128xf32>
    %143 = arith.addf %142, %31 : vector<16x128xf32>
    %cst_71 = arith.constant 0.000000e+00 : f32
    %144 = vector.broadcast %cst_71 : f32 to vector<16x128xf32>
    %145 = arith.maximumf %143, %144 : vector<16x128xf32>
    %cst_72 = arith.constant dense<0.000000e+00> : vector<2x16xf32>
    %146 = tpu.matmul %12, %145, %cst_72 {dimension_numbers = #tpu.dot_dimension_numbers<[1], [1], [0], [0], [0, 0, 1, 0], [], []>} : vector<2x128xf32>, vector<16x128xf32>, vector<2x16xf32> -> vector<2x16xf32>
    %147 = tpu.concatenate %84, %115, %146 in 1 : vector<2x16xf32>, vector<2x16xf32>, vector<2x16xf32> -> vector<2x48xf32>
    %c0_73 = arith.constant 0 : index
    %c0_74 = arith.constant 0 : index
    %148 = vector.load %arg13[%c0_73, %c0_74] : memref<2x48xf32, #tpu.memory_space<vmem>>, vector<2x48xf32>
    tpu.vector_store %arg13[%c0_73, %c0_74], %147 {strides = array<i32>} : memref<2x48xf32, #tpu.memory_space<vmem>>, vector<2x48xf32>,
    return
  }
}

</mosaic_0001>

<bundles_post_ra>
// kernel: tpu_custom_call.1
= control target key start
LH: loop header
LB: loop body
LE: loop exit
PB: predicated region body
PF: predicated region fallthrough
CT: control target
= control target key end

     0   :  { %vm4706_vm0 = vcmask 130048   ;;  %v3809_v3 = vmov 0   ;;  %vm452_vm1 = vcmask 64512   ;;  %s4692_s0 = inlined_call_operand.vmem [shape: f32[16,128], index: 0, kind: input, shape index: {}]   ;;  %s4693_s1 = inlined_call_operand.vmem [shape: f32[8,128], index: 1, kind: input, shape index: {}]   ;;  %s4694_s2 = inlined_call_operand.vmem [shape: s32[256,1], index: 2, kind: input, shape index: {}]   ;;  %s4695_s3 = inlined_call_operand.vmem [shape: s32[1,128], index: 3, kind: input, shape index: {}]   ;;  %s4696_s4 = inlined_call_operand.vmem [shape: f32[16,16], index: 4, kind: input, shape index: {}]   ;;  %s4697_s5 = inlined_call_operand.vmem [shape: f32[16,8], index: 5, kind: input, shape index: {}]   ;;  %s4698_s6 = inlined_call_operand.vmem [shape: f32[16,48], index: 6, kind: input, shape index: {}]   ;;  %s4699_s7 = inlined_call_operand.vmem [shape: f32[16,16], index: 7, kind: input, shape index: {}]   ;;  %s4700_s8 = inlined_call_operand.vmem [shape: f32[16,16], index: 8, kind: input, shape index: {}]   ;;  %s4701_s9 = inlined_call_operand.vmem [shape: f32[16,32], index: 9, kind: input, shape index: {}]   ;;  %s4702_s10 = inlined_call_operand.vmem [shape: f32[16,16], index: 10, kind: input, shape index: {}]   ;;  %s4703_s11 = inlined_call_operand.vmem [shape: f32[16,16], index: 11, kind: input, shape index: {}]   ;;  %s4704_s12 = inlined_call_operand.vmem [shape: f32[16,8], index: 12, kind: input, shape index: {}]   ;;  %s4705_s13 = inlined_call_operand.hbm [shape: f32[2,48], index: 13, kind: output, shape index: {}]  }
   0x1   :  { %v61_v0 = vld [vmem:[%s4694_s2 + $0x80] sm:$0xff]  ;;  %3771 = vset.pattern.permute.xlu1 %v3809_v3  ;;  %3770 = vset.pattern.permute.xlu0 %v3809_v3  ;;  %v348_v4 = vld [vmem:[%s4692_s0 + $0x8] sm:$0xff]  ;;  %v63_v10 = vld [vmem:[%s4694_s2 + $0x90] sm:$0xff] }
   0x2   :  { %v45_v1 = vld [vmem:[%s4694_s2] sm:$0xff]  ;;  %128 = vperm.xlu0 %3770, %v61_v0   ;;  %v62_v7 = vld [vmem:[%s4694_s2 + $0x88] sm:$0xff]  ;;  %v64_v11 = vld [vmem:[%s4694_s2 + $0x98] sm:$0xff] }
   0x3   :  { %v347_v2 = vld [vmem:[%s4692_s0] sm:$0xff]  ;;  %80 = vperm.xlu1 %3771, %v45_v1   ;;  %v46_v8 = vld [vmem:[%s4694_s2 + $0x8] sm:$0xff]  ;;  %v47_v12 = vld [vmem:[%s4694_s2 + $0x10] sm:$0xff] }
   0x4   :  { %v345_v5 = vld [vmem:[%s4696_s4] sm:$0xff]  ;;  %v3441_v6 = vpack.c.bf16 %v348_v4, %v347_v2  ;;  %v346_v9 = vld [vmem:[%s4696_s4 + $0x8] sm:$0xff]  ;;  %v48_v13 = vld [vmem:[%s4694_s2 + $0x18] sm:$0xff] }
   0x5   :  { %3145 = vmatprep.mubr.msk.f32.mxu0 %vm4706_vm0, %v345_v5  ;;  %v443_v14 = vld [vmem:[%s4693_s1] sm:$0xff]  ;;  %v442_v16 = vld [vmem:[%s4697_s5 + $0x8] sm:$0xff] }
   0x6   :  { %3442 = vmatprep.subr.bf16.mxu0 %v3441_v6  ;;  %131 = vperm.xlu0 %3770, %v62_v7   ;;  %v441_v15 = vld [vmem:[%s4697_s5] sm:$0xff] }
   0x7   :  { %3444 = vmatpush3.bf16.msra.mxu0 %v3441_v6  ;;  %83 = vperm.xlu1 %3771, %v46_v8  }
   0x8   :  { %3148 = vmatprep.subr.mxu1 %v443_v14 }
   0xa   :  { %3146 = vmatmul.mubr.msk.f32.vlgmr.msra.gmra.mrb[0].mxu0 %vm4706_vm0, %v346_v9  ;;  %134 = vperm.xlu0 %3770, %v63_v10  }
   0xb   :  { %137 = vperm.xlu1 %3771, %v64_v11  }
   0xc   :  { %18 = vsyncpa [#allocation3], 0  ;;  %v65_v17 = vld [vmem:[%s4694_s2 + $0xa0] sm:$0xff]  ;;  %v66_v18 = vld [vmem:[%s4694_s2 + $0xa8] sm:$0xff]  ;;  %3149 = vmatpush3.msra.mxu1 %v443_v14  ;;  %3150 = vmatprep.mubr.msk.f32.mxu1 %vm452_vm1, %v441_v15  ;;  %v3810_v43 = vmov 1   ;;  %v77_v44 = vlaneseq  ;;  %v4736_v6 = vmov 0 }
   0xd   :  { %3151 = vmatmul.mubr.msk.f32.vlgmr.msra.gmra.mrb[0].mxu1 %vm452_vm1, %v442_v16  ;;  %v49_v19 = vld [vmem:[%s4694_s2 + $0x20] sm:$0xff]  ;;  %v50_v20 = vld [vmem:[%s4694_s2 + $0x28] sm:$0xff]  ;;  %v67_v21 = vld [vmem:[%s4694_s2 + $0xb0] sm:$0xff]  ;;  %v3811_v52 = vmov 1.0|1.0   ;;  %s3823_s23 = smov 32  }
   0xe   :  { %86 = vperm.xlu0 %3770, %v47_v12   ;;  %v68_v22 = vld [vmem:[%s4694_s2 + $0xb8] sm:$0xff]  ;;  %v51_v23 = vld [vmem:[%s4694_s2 + $0x30] sm:$0xff]  ;;  %v69_v25 = vld [vmem:[%s4694_s2 + $0xc0] sm:$0xff]  ;;  %v4031_v45 = vand.u32 127, %v77_v44  ;;  %v4740_v12 = vmov 0  ;;  %s3824_s24 = smov [#allocation2]  }
   0xf   :  { %89 = vperm.xlu1 %3771, %v48_v13   ;;  %v52_v24 = vld [vmem:[%s4694_s2 + $0x38] sm:$0xff]  ;;  %v70_v26 = vld [vmem:[%s4694_s2 + $0xc8] sm:$0xff]  ;;  %v53_v27 = vld [vmem:[%s4694_s2 + $0x40] sm:$0xff]  ;;  %s2644_s25 = sshll.u32 %s3824_s24, 4  ;;  %s2645_s25 = int_to_ptr.vmem [resolvable:$true] %s2644_s25 }
  0x10   :  { %v54_v28 = vld [vmem:[%s4694_s2 + $0x48] sm:$0xff]  ;;  %v71_v29 = vld [vmem:[%s4694_s2 + $0xd0] sm:$0xff]  ;;  %v72_v30 = vld [vmem:[%s4694_s2 + $0xd8] sm:$0xff]  ;;  %p3790_p1 = scmp.lt.s32.totalorder %s2645_s25, %s2645_s25 }
  0x11   :  { %v55_v31 = vld [vmem:[%s4694_s2 + $0x50] sm:$0xff]  ;;  %v56_v32 = vld [vmem:[%s4694_s2 + $0x58] sm:$0xff]  ;;  %v73_v33 = vld [vmem:[%s4694_s2 + $0xe0] sm:$0xff] }
  0x12   :  { %140 = vperm.xlu0 %3770, %v65_v17   ;;  %v74_v34 = vld [vmem:[%s4694_s2 + $0xe8] sm:$0xff]  ;;  %v57_v35 = vld [vmem:[%s4694_s2 + $0x60] sm:$0xff]  ;;  %v75_v37 = vld [vmem:[%s4694_s2 + $0xf0] sm:$0xff] }
  0x13   :  { %143 = vperm.xlu1 %3771, %v66_v18   ;;  %v58_v36 = vld [vmem:[%s4694_s2 + $0x68] sm:$0xff]  ;;  %v76_v38 = vld [vmem:[%s4694_s2 + $0xf8] sm:$0xff]  ;;  %v59_v39 = vld [vmem:[%s4694_s2 + $0x70] sm:$0xff]  ;;  %v4744_v18 = vmov 0 }
  0x14   :  { %v60_v40 = vld [vmem:[%s4694_s2 + $0x78] sm:$0xff]  ;;  %v4017_v41 = vld [vmem:[%s4704_s12] sm:$0xff]  ;;  %v4022_v42 = vld [vmem:[%s4704_s12 + $0x8] sm:$0xff]  ;;  %s3785_s2 = scalar_lea.vmem %s2645_s25, 32 }
  0x15   :  { %p3786_p0 = scmp.ne.s32.totalorder %s2645_s25, %s3785_s2  ;;  %p3791_p2 = scmp.lt.s32.totalorder %s3785_s2, %s3785_s2 }
  0x16   :  { %92 = vperm.xlu0 %3770, %v49_v19  }
  0x17   :  { %95 = vperm.xlu1 %3771, %v50_v20   ;;  %p3792_p3 = por %p3791_p2, %p3790_p1 }
  0x19   :  { %p3793_p4 = pnand %p3792_p3, %p3786_p0 }
  0x1a   :  { %146 = vperm.xlu0 %3770, %v67_v21  }
  0x1b   :  { %149 = vperm.xlu1 %3771, %v68_v22  }
  0x1e   :  { %98 = vperm.xlu0 %3770, %v51_v23  }
  0x1f   :  { %101 = vperm.xlu1 %3771, %v52_v24   ;;  %v4748_v24 = vmov 0 }
  0x22   :  { %152 = vperm.xlu0 %3770, %v69_v25  }
  0x23   :  { %155 = vperm.xlu1 %3771, %v70_v26  }
  0x26   :  { %104 = vperm.xlu0 %3770, %v53_v27   ;;  %v4750_v27 = vmov 0 }
  0x27   :  { %107 = vperm.xlu1 %3771, %v54_v28  }
  0x2a   :  { %158 = vperm.xlu0 %3770, %v71_v29  }
  0x2b   :  { %161 = vperm.xlu1 %3771, %v72_v30   ;;  %v4752_v30 = vmov 0 }
  0x2e   :  { %110 = vperm.xlu0 %3770, %v55_v31  }
  0x2f   :  { %113 = vperm.xlu1 %3771, %v56_v32  }
  0x32   :  { %164 = vperm.xlu0 %3770, %v73_v33  }
  0x33   :  { %167 = vperm.xlu1 %3771, %v74_v34  }
  0x36   :  { %116 = vperm.xlu0 %3770, %v57_v35  }
  0x37   :  { %119 = vperm.xlu1 %3771, %v58_v36  }
  0x3a   :  { %170 = vperm.xlu0 %3770, %v75_v37  }
  0x3b   :  { %173 = vperm.xlu1 %3771, %v76_v38  }
  0x3e   :  { %122 = vperm.xlu0 %3770, %v59_v39  }
  0x3f   :  { %125 = vperm.xlu1 %3771, %v60_v40  }
  0x42   :  { %350 = vperm.xlu0 %3770, %v4017_v41  }
  0x43   :  { %354 = vperm.xlu1 %3771, %v4022_v42  }
  0x46   :  { %3772 = vset.pattern.permute.xlu0 %v3810_v43 }
  0x47   :  { %3773 = vset.pattern.permute.xlu1 %v3810_v43  ;;  %445 = vperm.xlu0 %3772, %v4017_v41  }
  0x48   :  { %449 = vperm.xlu1 %3773, %v4022_v42  }
  0x81   :  { %v129_v46 = vpop.permute.xlu0 %128 }
  0x82   :  { %v81_v47 = vpop.permute.xlu1 %80  ;;  %vm191_vm2 = vcmp.eq.s32.totalorder %v129_v46, %v4031_v45 }
  0x83   :  { %vm175_vm3 = vcmp.eq.s32.totalorder %v81_v47, %v4031_v45 }
  0x85   :  { %v132_v48 = vpop.permute.xlu0 %131 }
  0x86   :  { %v84_v49 = vpop.permute.xlu1 %83  ;;  %vm192_vm4 = vcmp.eq.s32.totalorder %v132_v48, %v4031_v45 }
  0x87   :  { %vm176_vm5 = vcmp.eq.s32.totalorder %v84_v49, %v4031_v45  ;;  %vm4037_vm6 = vmpackc.low %vm192_vm4, %vm191_vm2 }
  0x88   :  { %vm4041_vm7 = vmpackc.low %vm176_vm5, %vm175_vm3  ;;  %3446 = vmatprep.subr.msk.bf16.mxu1 %vm4037_vm6, %v3811_v52 }
  0x89   :  { %v135_v53 = vpop.permute.xlu0 %134  ;;  %3448 = vmatpush3.bf16.xpose.msk.msra.mxu1 %vm4041_vm7, %v3811_v52 }
  0x8a   :  { %v138_v54 = vpop.permute.xlu1 %137  ;;  %vm193_vm8 = vcmp.eq.s32.totalorder %v135_v53, %v4031_v45 }
  0x8b   :  { %vm194_vm9 = vcmp.eq.s32.totalorder %v138_v54, %v4031_v45 }
  0x8c   :  { %vm4053_vm10 = vmpackc.low %vm194_vm9, %vm193_vm8 }
  0x8d   :  { %3450 = vmatprep.subr.msk.bf16.mxu1 %vm4053_vm10, %v3811_v52  ;;  %v87_v56 = vpop.permute.xlu0 %86 }
  0x8e   :  { %v90_v57 = vpop.permute.xlu1 %89  ;;  %vm177_vm11 = vcmp.eq.s32.totalorder %v87_v56, %v4031_v45 }
  0x8f   :  { %vm178_vm12 = vcmp.eq.s32.totalorder %v90_v57, %v4031_v45  ;;  %v4182_v57 = vld [vmem:[%s4698_s6] sm:$0xff] }
  0x90   :  { %vm4062_vm13 = vmpackc.low %vm178_vm12, %vm177_vm11 }
  0x91   :  { %v141_v59 = vpop.permute.xlu0 %140  ;;  %3452 = vmatpush3.bf16.xpose.msk.msra.mxu1 %vm4062_vm13, %v3811_v52 }
  0x92   :  { %v144_v60 = vpop.permute.xlu1 %143  ;;  %vm195_vm14 = vcmp.eq.s32.totalorder %v141_v59, %v4031_v45  ;;  %v3812_v59 = vmov 2  }
  0x93   :  { %vm196_vm15 = vcmp.eq.s32.totalorder %v144_v60, %v4031_v45  ;;  %3775 = vset.pattern.permute.xlu0 %v3812_v59  ;;  %3774 = vset.pattern.permute.xlu1 %v3812_v59  ;;  %v4300_v59 = vld [vmem:[%s4701_s9] sm:$0xff] }
  0x94   :  { %vm4071_vm1 = vmpackc.low %vm196_vm15, %vm195_vm14  ;;  %290 = vperm.xlu0 %3775, %v4022_v42   ;;  %285 = vperm.xlu1 %3774, %v4017_v41  }
  0x95   :  { %3454 = vmatprep.subr.msk.bf16.mxu1 %vm4071_vm1, %v3811_v52  ;;  %v93_v62 = vpop.permute.xlu0 %92 }
  0x96   :  { %v96_v63 = vpop.permute.xlu1 %95  ;;  %vm179_vm2 = vcmp.eq.s32.totalorder %v93_v62, %v4031_v45 }
  0x97   :  { %vm180_vm3 = vcmp.eq.s32.totalorder %v96_v63, %v4031_v45 }
  0x98   :  { %vm4080_vm4 = vmpackc.low %vm180_vm3, %vm179_vm2 }
  0x99   :  { %v147_v1 = vpop.permute.xlu0 %146  ;;  %3456 = vmatpush3.bf16.xpose.msk.msra.mxu1 %vm4080_vm4, %v3811_v52 }
  0x9a   :  { %v150_v2 = vpop.permute.xlu1 %149  ;;  %vm197_vm5 = vcmp.eq.s32.totalorder %v147_v1, %v4031_v45 }
  0x9b   :  { %vm198_vm8 = vcmp.eq.s32.totalorder %v150_v2, %v4031_v45 }
  0x9c   :  { %vm4089_vm9 = vmpackc.low %vm198_vm8, %vm197_vm5 }
  0x9d   :  { %3458 = vmatprep.subr.msk.bf16.mxu1 %vm4089_vm9, %v3811_v52  ;;  %v99_v4 = vpop.permute.xlu0 %98 }
  0x9e   :  { %v102_v5 = vpop.permute.xlu1 %101  ;;  %vm181_vm11 = vcmp.eq.s32.totalorder %v99_v4, %v4031_v45 }
  0x9f   :  { %vm182_vm12 = vcmp.eq.s32.totalorder %v102_v5, %v4031_v45  ;;  %v4191_v5 = vld [vmem:[%s4698_s6 + $0x8] sm:$0xff] }
  0xa0   :  { %vm4098_vm14 = vmpackc.low %vm182_vm12, %vm181_vm11 }
  0xa1   :  { %v4737_v6 = vsel %vm4098_vm14, 4294967295, %v4736_v6  ;;  %v153_v7 = vpop.permute.xlu0 %152  ;;  %3460 = vmatpush3.bf16.xpose.msk.msra.mxu1 %vm4098_vm14, %v3811_v52 }
  0xa2   :  { %v156_v8 = vpop.permute.xlu1 %155  ;;  %vm199_vm15 = vcmp.eq.s32.totalorder %v153_v7, %v4031_v45  ;;  %v4198_v7 = vld [vmem:[%s4699_s7] sm:$0xff] }
  0xa3   :  { %vm200_vm2 = vcmp.eq.s32.totalorder %v156_v8, %v4031_v45  ;;  %v3813_v8 = vmov 3  }
  0xa4   :  { %vm4107_vm3 = vmpackc.low %vm200_vm2, %vm199_vm15  ;;  %3776 = vset.pattern.permute.xlu1 %v3813_v8 }
  0xa5   :  { %3462 = vmatprep.subr.msk.bf16.mxu1 %vm4107_vm3, %v3811_v52  ;;  %v105_v10 = vpop.permute.xlu0 %104  ;;  %294 = vperm.xlu1 %3776, %v4017_v41  }
  0xa6   :  { %v108_v11 = vpop.permute.xlu1 %107  ;;  %vm183_vm5 = vcmp.eq.s32.totalorder %v105_v10, %v4031_v45 }
  0xa7   :  { %vm184_vm8 = vcmp.eq.s32.totalorder %v108_v11, %v4031_v45 }
  0xa8   :  { %vm4116_vm11 = vmpackc.low %vm184_vm8, %vm183_vm5 }
  0xa9   :  { %v4741_v12 = vsel %vm4116_vm11, 4294967295, %v4740_v12  ;;  %v159_v13 = vpop.permute.xlu0 %158  ;;  %3464 = vmatpush3.bf16.xpose.msk.msra.mxu1 %vm4116_vm11, %v3811_v52  ;;  %298 = vperm.xlu1 %3776, %v4022_v42  }
  0xaa   :  { %v162_v14 = vpop.permute.xlu1 %161  ;;  %vm201_vm12 = vcmp.eq.s32.totalorder %v159_v13, %v4031_v45 }
  0xab   :  { %vm202_vm15 = vcmp.eq.s32.totalorder %v162_v14, %v4031_v45 }
  0xac   :  { %vm4125_vm2 = vmpackc.low %vm202_vm15, %vm201_vm12 }
  0xad   :  { %3466 = vmatprep.subr.msk.bf16.mxu1 %vm4125_vm2, %v3811_v52  ;;  %v111_v16 = vpop.permute.xlu0 %110 }
  0xae   :  { %v114_v17 = vpop.permute.xlu1 %113  ;;  %vm185_vm5 = vcmp.eq.s32.totalorder %v111_v16, %v4031_v45 }
  0xaf   :  { %vm186_vm8 = vcmp.eq.s32.totalorder %v114_v17, %v4031_v45 }
  0xb0   :  { %vm4134_vm0 = vmpackc.low %vm186_vm8, %vm185_vm5 }
  0xb1   :  { %v4745_v18 = vsel %vm4134_vm0, 4294967295, %v4744_v18  ;;  %v165_v19 = vpop.permute.xlu0 %164  ;;  %3468 = vmatpush3.bf16.xpose.msk.msra.mxu1 %vm4134_vm0, %v3811_v52 }
  0xb2   :  { %v168_v20 = vpop.permute.xlu1 %167  ;;  %vm203_vm12 = vcmp.eq.s32.totalorder %v165_v19, %v4031_v45 }
  0xb3   :  { %vm204_vm15 = vcmp.eq.s32.totalorder %v168_v20, %v4031_v45 }
  0xb4   :  { %vm4143_vm11 = vmpackc.low %vm204_vm15, %vm203_vm12 }
  0xb5   :  { %3470 = vmatprep.subr.msk.bf16.mxu1 %vm4143_vm11, %v3811_v52  ;;  %v117_v22 = vpop.permute.xlu0 %116 }
  0xb6   :  { %v120_v23 = vpop.permute.xlu1 %119  ;;  %vm187_vm5 = vcmp.eq.s32.totalorder %v117_v22, %v4031_v45 }
  0xb7   :  { %vm188_vm8 = vcmp.eq.s32.totalorder %v120_v23, %v4031_v45  ;;  %v4213_v23 = vld [vmem:[%s4699_s7 + $0x8] sm:$0xff] }
  0xb8   :  { %vm4152_vm0 = vmpackc.low %vm188_vm8, %vm187_vm5 }
  0xb9   :  { %v4749_v24 = vsel %vm4152_vm0, 4294967295, %v4748_v24  ;;  %v171_v25 = vpop.permute.xlu0 %170  ;;  %3472 = vmatpush3.bf16.xpose.msk.msra.mxu1 %vm4152_vm0, %v3811_v52 }
  0xba   :  { %v174_v26 = vpop.permute.xlu1 %173  ;;  %vm205_vm12 = vcmp.eq.s32.totalorder %v171_v25, %v4031_v45  ;;  %v4220_v25 = vld [vmem:[%s4700_s8] sm:$0xff] }
  0xbb   :  { %vm206_vm15 = vcmp.eq.s32.totalorder %v174_v26, %v4031_v45  ;;  %v3814_v26 = vmov 4  }
  0xbc   :  { %vm4161_vm14 = vmpackc.low %vm206_vm15, %vm205_vm12  ;;  %vm4716_vm12 = vcmask 392192   ;;  %vm4754_vm15 = vcmask 130048   ;;  %3778 = vset.pattern.permute.xlu1 %v3814_v26  ;;  %3777 = vset.pattern.permute.xlu0 %v3814_v26 }
  0xbd   :  { %v4751_v27 = vsel %vm4161_vm14, 4294967295, %v4750_v27  ;;  %3474 = vmatprep.subr.msk.bf16.mxu1 %vm4161_vm14, %v3811_v52  ;;  %v123_v28 = vpop.permute.xlu0 %122  ;;  %3165 = vmatprep.mubr.msk.f32.mxu0 %vm4716_vm12, %v4182_v57 }
  0xbe   :  { %v126_v29 = vpop.permute.xlu1 %125  ;;  %vm189_vm5 = vcmp.eq.s32.totalorder %v123_v28, %v4031_v45  ;;  %306 = vperm.xlu1 %3778, %v4022_v42   ;;  %302 = vperm.xlu0 %3777, %v4017_v41  }
  0xbf   :  { %vm190_vm8 = vcmp.eq.s32.totalorder %v126_v29, %v4031_v45 }
  0xc0   :  { %vm4170_vm0 = vmpackc.low %vm190_vm8, %vm189_vm5 }
  0xc1   :  { %v4753_v30 = vsel %vm4170_vm0, 4294967295, %v4752_v30  ;;  %3476 = vmatpush3.bf16.xpose.msk.msra.mxu1 %vm4170_vm0, %v3811_v52  ;;  %v351_v33 = vpop.permute.xlu0 %350  ;;  %vm4755_vm5 = vmmov %vm4754_vm15 }
  0xc2   :  { %v355_v31 = vpop.permute.xlu1 %354  ;;  %vm4756_vm8 = vmmov %vm4755_vm5 }
  0xc6   :  { %v446_v46 = vpop.permute.xlu0 %445 }
  0xc7   :  { %v450_v47 = vpop.permute.xlu1 %449 }
  0xdd   :  { %v3147_v32 = vpop.f32.mrb[0].mxu0 }
  0xde   :  { %v436_v34 = vadd.f32 %v3147_v32, %v355_v31  ;;  %v430_v35 = vpop.f32.mrb[1].mxu0 }
  0xdf   :  { %v431_v36 = vadd.f32 %v430_v35, %v351_v33 }
  0xe0   :  { %v440_v37 = vmax.f32 %v436_v34, 0.0  ;;  %v3152_v40 = vpop.f32.mrb[0].mxu1 }
  0xe1   :  { %v439_v38 = vmax.f32 %v431_v36, 0.0  ;;  %v525_v45 = vpop.f32.mrb[1].mxu1  ;;  %v531_v49 = vadd.f32 %v3152_v40, %v450_v47 }
  0xe2   :  { %v526_v48 = vadd.f32 %v525_v45, %v446_v46 }
  0xe3   :  { %2912 = vmatprep.mubr.f32.mxu1 %v439_v38  ;;  %v4177_v39 = vpack.c.bf16 %v440_v37, %v439_v38  ;;  %v535_v54 = vmax.f32 %v531_v49, 0.0 }
  0xe4   :  { %2913 = vmatmul.mubr.f32.vlgmr.msra.gmra.mrb[2].mxu1 %v439_v38  ;;  %v534_v53 = vmax.f32 %v526_v48, 0.0  ;;  %v4235_v38 = vld [vmem:[%s4700_s8 + $0x8] sm:$0xff] }
  0xe5   :  { %2914 = vmatprep.mubr.f32.mxu1 %v440_v37 }
  0xe6   :  { %v3485_v56 = vpack.c.bf16 %v535_v54, %v534_v53 }
  0xe8   :  { %2915 = vmatmul.mubr.f32.gmra.mrb[4].mxu1 %v440_v37 }
 0x113   :  { %v4204_v10 = vpop.permute.xlu0 %290  ;;  %v4206_v11 = vpop.permute.xlu1 %285 }
 0x124   :  { %v4226_v28 = vpop.permute.xlu1 %294 }
 0x128   :  { %v4228_v29 = vpop.permute.xlu1 %298 }
 0x13d   :  { %v4288_v40 = vpop.permute.xlu1 %306  ;;  %v4290_v45 = vpop.permute.xlu0 %302 }
 0x1b7   :  { %v602_v60 = vpop.f32.mrb[2].mxu1 }
 0x1b8   :  { %v604_v62 = vpop.f32.mrb[3].mxu1 }
 0x1bb   :  { %v608_v63 = vpop.f32.mrb[4].mxu1 }
 0x1bc   :  { %v3477_v1 = vpack.c.bf16 %v608_v63, %v602_v60  ;;  %v610_v2 = vpop.f32.mrb[5].mxu1  ;;  %v3815_v60 = vmov 5  }
 0x1bd   :  { %v3481_v4 = vpack.c.bf16 %v610_v2, %v604_v62  ;;  %3780 = vset.pattern.permute.xlu0 %v3815_v60  ;;  %3779 = vset.pattern.permute.xlu1 %v3815_v60  ;;  %v4316_v2 = vld [vmem:[%s4702_s10] sm:$0xff] }
 0x1be   :  { %3478 = vmatprep.subr.bf16.mxu0 %v3477_v1  ;;  %314 = vperm.xlu0 %3780, %v4022_v42  }
 0x1bf   :  { %3480 = vmatpush3.bf16.msra.mxu0 %v3477_v1  ;;  %310 = vperm.xlu1 %3779, %v4017_v41  }
 0x1c0   :  { %3482 = vmatprep.subr.bf16.mxu0 %v3481_v4 }
 0x1c3   :  { %3484 = vmatpush3.bf16.msra.mxu0 %v3481_v4  ;;  %v3816_v4 = vmov 6  }
 0x1c4   :  { %3486 = vmatprep.subr.bf16.mxu0 %v3485_v56  ;;  %3781 = vset.pattern.permute.xlu1 %v3816_v4 }
 0x1c5   :  { %318 = vperm.xlu1 %3781, %v4017_v41  }
 0x1c7   :  { %3488 = vmatpush3.bf16.msra.mxu0 %v3485_v56 }
 0x1c9   :  { %322 = vperm.xlu1 %3781, %v4022_v42  }
 0x1ca   :  { %3166 = vmatmul.mubr.msk.f32.vlgmr.msra.gmra.mrb[2].mxu0 %vm4716_vm12, %v4191_v5  ;;  %vm4763_vm12 = vnez %v4749_v24 }
 0x1cb   :  { %3172 = vmatprep.mubr.msk.f32.mxu0 %vm4754_vm15, %v4198_v7  ;;  %vm4757_vm15 = vmmov %vm4755_vm5 }
 0x23d   :  { %v4322_v8 = vpop.permute.xlu0 %314 }
 0x29d   :  { %v3167_v13 = vpop.f32.mrb[2].mxu0 }
 0x29e   :  { %v692_v14 = vadd.f32 %v3167_v13, %v4204_v10  ;;  %v686_v16 = vpop.f32.mrb[3].mxu0  ;;  %v4324_v13 = vpop.permute.xlu1 %310 }
 0x29f   :  { %v687_v17 = vadd.f32 %v686_v16, %v4206_v11 }
 0x2a0   :  { %v696_v19 = vmax.f32 %v692_v14, 0.0 }
 0x2a1   :  { %v695_v20 = vmax.f32 %v687_v17, 0.0 }
 0x2a3   :  { %v3489_v22 = vpack.c.bf16 %v696_v19, %v695_v20 }
 0x2a5   :  { %3490 = vmatprep.subr.bf16.mxu0 %v3489_v22 }
 0x2a6   :  { %3492 = vmatpush3.bf16.msra.mxu0 %v3489_v22 }
 0x2a9   :  { %3173 = vmatmul.mubr.msk.f32.vlgmr.msra.gmra.mrb[4].mxu0 %vm4755_vm5, %v4213_v23  ;;  %vm4715_vm5 = vcmask 261120  }
 0x2aa   :  { %3179 = vmatprep.mubr.msk.f32.mxu0 %vm4756_vm8, %v4220_v25 }
 0x37c   :  { %v3174_v31 = vpop.f32.mrb[4].mxu0 }
 0x37d   :  { %v775_v32 = vadd.f32 %v3174_v31, %v4228_v29  ;;  %v769_v33 = vpop.f32.mrb[5].mxu0  ;;  %v4331_v31 = vld [vmem:[%s4702_s10 + $0x8] sm:$0xff] }
 0x37e   :  { %v770_v34 = vadd.f32 %v769_v33, %v4226_v28  ;;  %v3817_v33 = vmov 7  }
 0x37f   :  { %v779_v35 = vmax.f32 %v775_v32, 0.0  ;;  %v4338_v32 = vld [vmem:[%s4703_s11] sm:$0xff]  ;;  %3783 = vset.pattern.permute.xlu1 %v3817_v33  ;;  %3782 = vset.pattern.permute.xlu0 %v3817_v33 }
 0x380   :  { %v778_v36 = vmax.f32 %v770_v34, 0.0  ;;  %330 = vperm.xlu1 %3783, %v4022_v42   ;;  %326 = vperm.xlu0 %3782, %v4017_v41   ;;  %v4345_v34 = vpop.permute.xlu1 %318  ;;  %v4354_v41 = vld [vmem:[%s4703_s11 + $0x8] sm:$0xff]  ;;  %v3818_v42 = vmov 0.0|0.0  }
 0x381   :  { %3545 = vmatprep.subr.bf16.mxu1 %v3818_v42 }
 0x382   :  { %v3493_v37 = vpack.c.bf16 %v779_v35, %v778_v36 }
 0x384   :  { %3494 = vmatprep.subr.bf16.mxu0 %v3493_v37  ;;  %3784 = vset.pattern.permute.xlu0 %v3810_v43  ;;  %v4347_v35 = vpop.permute.xlu1 %322 }
 0x385   :  { %3496 = vmatpush3.bf16.msra.mxu0 %v3493_v37 }
 0x386   :  { %3498 = vmatprep.subr.msk.bf16.mxu0 %vm4037_vm6, %v3811_v52 }
 0x388   :  { %3180 = vmatmul.mubr.msk.f32.vlgmr.msra.gmra.mrb[6].mxu0 %vm4757_vm15, %v4235_v38  ;;  %vm4758_vm15 = vmmov %vm4756_vm8 }
 0x389   :  { %3500 = vmatpush3.bf16.msk.msra.mxu0 %vm4037_vm6, %v3811_v52 }
 0x38a   :  { %3502 = vmatprep.subr.msk.bf16.mxu0 %vm4053_vm10, %v3811_v52 }
 0x38d   :  { %3504 = vmatpush3.bf16.msk.msra.mxu0 %vm4053_vm10, %v3811_v52 }
 0x38e   :  { %3506 = vmatprep.subr.msk.bf16.mxu0 %vm4071_vm1, %v3811_v52 }
 0x391   :  { %3508 = vmatpush3.bf16.msk.msra.mxu0 %vm4071_vm1, %v3811_v52 }
 0x392   :  { %3510 = vmatprep.subr.msk.bf16.mxu0 %vm4089_vm9, %v3811_v52 }
 0x395   :  { %3512 = vmatpush3.bf16.msk.msra.mxu0 %vm4089_vm9, %v3811_v52 }
 0x396   :  { %3514 = vmatprep.subr.msk.bf16.mxu0 %vm4107_vm3, %v3811_v52 }
 0x399   :  { %3516 = vmatpush3.bf16.msk.msra.mxu0 %vm4107_vm3, %v3811_v52 }
 0x39a   :  { %3518 = vmatprep.subr.msk.bf16.mxu0 %vm4125_vm2, %v3811_v52 }
 0x39d   :  { %3520 = vmatpush3.bf16.msk.msra.mxu0 %vm4125_vm2, %v3811_v52 }
 0x39e   :  { %3522 = vmatprep.subr.msk.bf16.mxu0 %vm4143_vm11, %v3811_v52 }
 0x3a1   :  { %3524 = vmatpush3.bf16.msk.msra.mxu0 %vm4143_vm11, %v3811_v52 }
 0x3a2   :  { %3526 = vmatprep.subr.msk.bf16.mxu0 %vm4161_vm14, %v3811_v52 }
 0x3a5   :  { %3528 = vmatpush3.bf16.msk.msra.mxu0 %vm4161_vm14, %v3811_v52 }
 0x3a6   :  { %3530 = vmatprep.subr.bf16.mxu0 %v4177_v39 }
 0x3ff   :  { %v4408_v43 = vpop.permute.xlu1 %330 }
 0x45b   :  { %v3181_v46 = vpop.f32.mrb[6].mxu0 }
 0x45c   :  { %v858_v47 = vadd.f32 %v3181_v46, %v4288_v40  ;;  %v852_v48 = vpop.f32.mrb[7].mxu0 }
 0x45d   :  { %v853_v49 = vadd.f32 %v852_v48, %v4290_v45 }
 0x45e   :  { %v862_v53 = vmax.f32 %v858_v47, 0.0 }
 0x45f   :  { %v861_v54 = vmax.f32 %v853_v49, 0.0 }
 0x461   :  { %v4294_v56 = vpack.c.bf16 %v862_v53, %v861_v54  ;;  %3214 = vmatprep.mubr.f32.mxu0 %v861_v54  ;;  %v4410_v54 = vpop.permute.xlu0 %326 }
 0x462   :  { %3215 = vmatmul.mubr.f32.vlgmr.msra.gmra.mrb[8].mxu0 %v862_v53 }
 0x463   :  { %3532 = vmatpush3.bf16.msra.mxu0 %v4177_v39  ;;  %3225 = vmatprep.mubr.msk.f32.mxu0 %vm4715_vm5, %v4300_v59  ;;  %v4309_v39 = vld [vmem:[%s4701_s9 + $0x8] sm:$0xff] }
 0x535   :  { %v3216_v62 = vpop.f32.mrb[8].mxu0 }
 0x536   :  { %v929_v63 = vpop.f32.mrb[9].mxu0 }
 0x537   :  { %v3533_v1 = vpack.c.bf16 %v3216_v62, %v929_v63 }
 0x539   :  { %3534 = vmatprep.subr.bf16.mxu0 %v3533_v1 }
 0x53a   :  { %3536 = vmatpush3.bf16.msra.mxu0 %v3533_v1 }
 0x53d   :  { %3226 = vmatmul.mubr.msk.f32.vlgmr.msra.gmra.mrb[10].mxu0 %vm4715_vm5, %v4309_v39  ;;  %vm4762_vm5 = vnez %v4745_v18 }
 0x53e   :  { %3232 = vmatprep.mubr.msk.f32.mxu0 %vm4756_vm8, %v4316_v2 }
 0x610   :  { %v3227_v14 = vpop.f32.mrb[10].mxu0 }
 0x611   :  { %v1017_v16 = vadd.f32 %v3227_v14, %v4322_v8  ;;  %v1011_v17 = vpop.f32.mrb[11].mxu0 }
 0x612   :  { %v1012_v19 = vadd.f32 %v1011_v17, %v4324_v13  ;;  %v4418_v17 = vshrl.u32 %v77_v44, 7 }
 0x613   :  { %v1021_v20 = vmax.f32 %v1017_v16, 0.0 }
 0x614   :  { %v1020_v22 = vmax.f32 %v1012_v19, 0.0  ;;  %v4423_v19 = vld [vmem:[%s4695_s3] ss:$0 sm:$0xff]  ;;  %s3822_s3 = smov 16  }
 0x616   :  { %v3537_v26 = vpack.c.bf16 %v1021_v20, %v1020_v22  ;;  %v3820_v20 = vmov 0.0   ;;  %v3821_v22 = vmov 1.0  }
 0x618   :  { %3538 = vmatprep.subr.bf16.mxu0 %v3537_v26 }
 0x619   :  { %3540 = vmatpush3.bf16.msra.mxu0 %v3537_v26 }
 0x61c   :  { %3233 = vmatmul.mubr.msk.f32.vlgmr.msra.gmra.mrb[12].mxu0 %vm4758_vm15, %v4331_v31  ;;  %vm4759_vm15 = vmmov %vm4756_vm8 }
 0x61d   :  { %3239 = vmatprep.mubr.msk.f32.mxu0 %vm4756_vm8, %v4338_v32  ;;  %vm4760_vm8 = vnez %v4737_v6 }
 0x6ef   :  { %v3234_v36 = vpop.f32.mrb[12].mxu0 }
 0x6f0   :  { %v1100_v37 = vadd.f32 %v3234_v36, %v4347_v35  ;;  %v1094_v46 = vpop.f32.mrb[13].mxu0 }
 0x6f1   :  { %v1095_v47 = vadd.f32 %v1094_v46, %v4345_v34 }
 0x6f2   :  { %v1104_v48 = vmax.f32 %v1100_v37, 0.0 }
 0x6f3   :  { %v1103_v49 = vmax.f32 %v1095_v47, 0.0 }
 0x6f5   :  { %v3541_v53 = vpack.c.bf16 %v1104_v48, %v1103_v49 }
 0x6f7   :  { %3542 = vmatprep.subr.bf16.mxu0 %v3541_v53 }
 0x6f8   :  { %3544 = vmatpush3.bf16.msra.mxu0 %v3541_v53 }
 0x6f9   :  { %3549 = vmatprep.subr.msk.bf16.mxu0 %vm4037_vm6, %v3811_v52 }
 0x6fb   :  { %3240 = vmatmul.mubr.msk.f32.vlgmr.msra.gmra.mrb[14].mxu0 %vm4759_vm15, %v4354_v41  ;;  %vm4761_vm15 = vnez %v4741_v12 }
 0x701   :  { %3551 = vmatpush3.bf16.xpose.msk.msra.mxu0 %vm4041_vm7, %v3811_v52 }
 0x702   :  { %3553 = vmatprep.subr.msk.bf16.mxu0 %vm4053_vm10, %v3811_v52 }
 0x709   :  { %3555 = vmatpush3.bf16.xpose.msk.msra.mxu0 %vm4062_vm13, %v3811_v52 }
 0x70a   :  { %3557 = vmatprep.subr.msk.bf16.mxu0 %vm4071_vm1, %v3811_v52 }
 0x711   :  { %3559 = vmatpush3.bf16.xpose.msk.msra.mxu0 %vm4080_vm4, %v3811_v52 }
 0x712   :  { %3561 = vmatprep.subr.msk.bf16.mxu0 %vm4089_vm9, %v3811_v52 }
 0x719   :  { %3563 = vmatpush3.bf16.xpose.msk.msra.mxu0 %vm4760_vm8, %v3811_v52 }
 0x71a   :  { %3565 = vmatprep.subr.msk.bf16.mxu0 %vm4107_vm3, %v3811_v52 }
 0x721   :  { %3567 = vmatpush3.bf16.xpose.msk.msra.mxu0 %vm4761_vm15, %v3811_v52 }
 0x722   :  { %3569 = vmatprep.subr.msk.bf16.mxu0 %vm4125_vm2, %v3811_v52 }
 0x729   :  { %3571 = vmatpush3.bf16.xpose.msk.msra.mxu0 %vm4762_vm5, %v3811_v52  ;;  %vm4764_vm5 = vcmask 392192  }
 0x72a   :  { %3573 = vmatprep.subr.msk.bf16.mxu0 %vm4143_vm11, %v3811_v52 }
 0x731   :  { %3575 = vmatpush3.bf16.xpose.msk.msra.mxu0 %vm4763_vm12, %v3811_v52  ;;  %vm4719_vm12 = vcmp.eq.s32.totalorder %v4423_v19, %v4418_v17 }
 0x732   :  { %3577 = vmatprep.subr.msk.bf16.mxu0 %vm4161_vm14, %v3811_v52 }
 0x739   :  { %3579 = vmatpush3.bf16.xpose.msk.msra.mxu0 %vm4170_vm0, %v3811_v52  ;;  %vm4718_vm0 = vmmov 0  }
 0x73a   :  { %3648 = vmatprep.subr.bf16.mxu0 %v3818_v42  ;;  %3246 = vmatprep.mubr.msk.f32.mxu1 %vm4718_vm0, %v3820_v20 }
 0x7ce   :  { %v3241_v60 = vpop.f32.mrb[14].mxu0 }
 0x7cf   :  { %v1183_v62 = vadd.f32 %v3241_v60, %v4408_v43  ;;  %v1177_v63 = vpop.f32.mrb[15].mxu0 }
 0x7d0   :  { %v1178_v1 = vadd.f32 %v1177_v63, %v4410_v54 }
 0x7d1   :  { %v1187_v4 = vmax.f32 %v1183_v62, 0.0 }
 0x7d2   :  { %v1186_v14 = vmax.f32 %v1178_v1, 0.0 }
 0x7d4   :  { %v4414_v16 = vpack.c.bf16 %v1187_v4, %v1186_v14  ;;  %2999 = vmatprep.mubr.f32.mxu0 %v1186_v14 }
 0x7d5   :  { %3000 = vmatmul.mubr.f32.vlgmr.msra.gmra.mrb[16].mxu0 %v1186_v14 }
 0x7d6   :  { %3547 = vmatpush3.bf16.xpose.msra.mxu1 %v4414_v16  ;;  %3001 = vmatprep.mubr.f32.mxu0 %v1187_v4 }
 0x7d9   :  { %3002 = vmatmul.mubr.f32.gmra.mrb[18].mxu0 %v1187_v4 }
 0x7da   :  { %3342 = vmatprep.mubr.msk.f32.mxu0 %vm4718_vm0, %v3820_v20  ;;  %vm4765_vm0 = vmmov %vm4764_vm5 }
 0x7dd   :  { %3247 = vmatmul.mubr.msk.f32.vlgmr.msra.gmra.mrb[6].mxu1 %vm4719_vm12, %v3821_v22  ;;  %vm4766_vm12 = vcmask 130048  }
 0x7de   :  { %3261 = vmatprep.mubr.msk.f32.mxu1 %vm4764_vm5, %v4182_v57  ;;  %vm4767_vm5 = vmmov %vm4766_vm12 }
 0x8a8   :  { %v1324_v44 = vpop.f32.mrb[16].mxu0 }
 0x8a9   :  { %v1326_v26 = vpop.f32.mrb[17].mxu0 }
 0x8ac   :  { %v1330_v33 = vpop.f32.mrb[18].mxu0 }
 0x8ad   :  { %v3580_v36 = vpack.c.bf16 %v1330_v33, %v1324_v44  ;;  %v1332_v37 = vpop.f32.mrb[19].mxu0 }
 0x8ae   :  { %v3584_v46 = vpack.c.bf16 %v1332_v37, %v1326_v26 }
 0x8af   :  { %3581 = vmatprep.subr.bf16.mxu1 %v3580_v36 }
 0x8b0   :  { %3583 = vmatpush3.bf16.msra.mxu1 %v3580_v36  ;;  %v4443_v47 = vpop.f32.mrb[6].mxu1 }
 0x8b1   :  { %3585 = vmatprep.subr.bf16.mxu1 %v3584_v46  ;;  %v3248_v48 = vpop.f32.mrb[7].mxu1 }
 0x8b4   :  { %3587 = vmatpush3.bf16.msra.mxu1 %v3584_v46 }
 0x8b5   :  { %3589 = vmatprep.subr.bf16.mxu1 %v4294_v56 }
 0x8b8   :  { %3591 = vmatpush3.bf16.msra.mxu1 %v4294_v56 }
 0x8bb   :  { %3262 = vmatmul.mubr.msk.f32.vlgmr.msra.gmra.mrb[8].mxu1 %vm4765_vm0, %v4191_v5  ;;  %vm4768_vm0 = vmmov %vm4767_vm5 }
 0x8bc   :  { %3268 = vmatprep.mubr.msk.f32.mxu1 %vm4766_vm12, %v4198_v7  ;;  %vm4769_vm12 = vmmov %vm4768_vm0 }
 0x98e   :  { %v3263_v49 = vpop.f32.mrb[8].mxu1 }
 0x98f   :  { %v1407_v53 = vadd.f32 %v3263_v49, %v4204_v10  ;;  %v1401_v60 = vpop.f32.mrb[9].mxu1 }
 0x990   :  { %v1402_v62 = vadd.f32 %v1401_v60, %v4206_v11 }
 0x991   :  { %v1411_v63 = vmax.f32 %v1407_v53, 0.0 }
 0x992   :  { %v1410_v1 = vmax.f32 %v1402_v62, 0.0 }
 0x994   :  { %v3592_v4 = vpack.c.bf16 %v1411_v63, %v1410_v1 }
 0x996   :  { %3593 = vmatprep.subr.bf16.mxu1 %v3592_v4 }
 0x997   :  { %3595 = vmatpush3.bf16.msra.mxu1 %v3592_v4 }
 0x99a   :  { %3269 = vmatmul.mubr.msk.f32.vlgmr.msra.gmra.mrb[10].mxu1 %vm4767_vm5, %v4213_v23  ;;  %vm4770_vm5 = vcmask 261120  }
 0x99b   :  { %3275 = vmatprep.mubr.msk.f32.mxu1 %vm4768_vm0, %v4220_v25  ;;  %vm4771_vm0 = vmmov %vm4770_vm5 }
 0xa6d   :  { %v3270_v56 = vpop.f32.mrb[10].mxu1 }
 0xa6e   :  { %v1484_v14 = vadd.f32 %v3270_v56, %v4228_v29  ;;  %v1478_v44 = vpop.f32.mrb[11].mxu1 }
 0xa6f   :  { %v1479_v26 = vadd.f32 %v1478_v44, %v4226_v28 }
 0xa70   :  { %v1488_v33 = vmax.f32 %v1484_v14, 0.0 }
 0xa71   :  { %v1487_v36 = vmax.f32 %v1479_v26, 0.0 }
 0xa73   :  { %v3596_v37 = vpack.c.bf16 %v1488_v33, %v1487_v36 }
 0xa75   :  { %3597 = vmatprep.subr.bf16.mxu1 %v3596_v37 }
 0xa76   :  { %3599 = vmatpush3.bf16.msra.mxu1 %v3596_v37 }
 0xa77   :  { %3601 = vmatprep.subr.msk.bf16.mxu1 %vm4037_vm6, %v3811_v52 }
 0xa79   :  { %3276 = vmatmul.mubr.msk.f32.vlgmr.msra.gmra.mrb[12].mxu1 %vm4769_vm12, %v4235_v38 }
 0xa7a   :  { %3603 = vmatpush3.bf16.msk.msra.mxu1 %vm4037_vm6, %v3811_v52 }
 0xa7b   :  { %3605 = vmatprep.subr.msk.bf16.mxu1 %vm4053_vm10, %v3811_v52 }
 0xa7e   :  { %3607 = vmatpush3.bf16.msk.msra.mxu1 %vm4053_vm10, %v3811_v52 }
 0xa7f   :  { %3609 = vmatprep.subr.msk.bf16.mxu1 %vm4071_vm1, %v3811_v52 }
 0xa82   :  { %3611 = vmatpush3.bf16.msk.msra.mxu1 %vm4071_vm1, %v3811_v52 }
 0xa83   :  { %3613 = vmatprep.subr.msk.bf16.mxu1 %vm4089_vm9, %v3811_v52 }
 0xa86   :  { %3615 = vmatpush3.bf16.msk.msra.mxu1 %vm4089_vm9, %v3811_v52 }
 0xa87   :  { %3617 = vmatprep.subr.msk.bf16.mxu1 %vm4107_vm3, %v3811_v52 }
 0xa8a   :  { %3619 = vmatpush3.bf16.msk.msra.mxu1 %vm4107_vm3, %v3811_v52 }
 0xa8b   :  { %3621 = vmatprep.subr.msk.bf16.mxu1 %vm4125_vm2, %v3811_v52 }
 0xa8e   :  { %3623 = vmatpush3.bf16.msk.msra.mxu1 %vm4125_vm2, %v3811_v52 }
 0xa8f   :  { %3625 = vmatprep.subr.msk.bf16.mxu1 %vm4143_vm11, %v3811_v52 }
 0xa92   :  { %3627 = vmatpush3.bf16.msk.msra.mxu1 %vm4143_vm11, %v3811_v52 }
 0xa93   :  { %3629 = vmatprep.subr.msk.bf16.mxu1 %vm4161_vm14, %v3811_v52 }
 0xa96   :  { %3631 = vmatpush3.bf16.msk.msra.mxu1 %vm4161_vm14, %v3811_v52 }
 0xa97   :  { %3633 = vmatprep.subr.bf16.mxu1 %v4414_v16 }
 0xb4c   :  { %v3277_v46 = vpop.f32.mrb[12].mxu1 }
 0xb4d   :  { %v1561_v48 = vadd.f32 %v3277_v46, %v4288_v40  ;;  %v1555_v49 = vpop.f32.mrb[13].mxu1 }
 0xb4e   :  { %v1556_v53 = vadd.f32 %v1555_v49, %v4290_v45 }
 0xb4f   :  { %v1565_v60 = vmax.f32 %v1561_v48, 0.0 }
 0xb50   :  { %v1564_v62 = vmax.f32 %v1556_v53, 0.0 }
 0xb52   :  { %v4506_v63 = vpack.c.bf16 %v1565_v60, %v1564_v62  ;;  %3310 = vmatprep.mubr.f32.mxu1 %v1564_v62 }
 0xb53   :  { %3311 = vmatmul.mubr.f32.vlgmr.msra.gmra.mrb[14].mxu1 %v1565_v60 }
 0xb54   :  { %3635 = vmatpush3.bf16.msra.mxu1 %v4414_v16  ;;  %3321 = vmatprep.mubr.msk.f32.mxu1 %vm4770_vm5, %v4300_v59  ;;  %vm4772_vm5 = vmmov %vm4769_vm12 }
 0xb55   :  { %vm4773_vm14 = vmmov %vm4772_vm5 }
 0xc26   :  { %v3312_v1 = vpop.f32.mrb[14].mxu1 }
 0xc27   :  { %v1632_v4 = vpop.f32.mrb[15].mxu1 }
 0xc28   :  { %v3636_v56 = vpack.c.bf16 %v3312_v1, %v1632_v4 }
 0xc2a   :  { %3637 = vmatprep.subr.bf16.mxu1 %v3636_v56 }
 0xc2b   :  { %3639 = vmatpush3.bf16.msra.mxu1 %v3636_v56 }
 0xc2e   :  { %3322 = vmatmul.mubr.msk.f32.vlgmr.msra.gmra.mrb[16].mxu1 %vm4771_vm0, %v4309_v39  ;;  %vm4774_vm0 = vmmov %vm4772_vm5 }
 0xc2f   :  { %3328 = vmatprep.mubr.msk.f32.mxu1 %vm4769_vm12, %v4316_v2  ;;  %vm4781_vm12 = vcmask 392192  }
 0xd01   :  { %v3323_v14 = vpop.f32.mrb[16].mxu1 }
 0xd02   :  { %v1713_v44 = vadd.f32 %v3323_v14, %v4322_v8  ;;  %v1707_v26 = vpop.f32.mrb[17].mxu1 }
 0xd03   :  { %v1708_v16 = vadd.f32 %v1707_v26, %v4324_v13 }
 0xd04   :  { %v1717_v33 = vmax.f32 %v1713_v44, 0.0 }
 0xd05   :  { %v1716_v36 = vmax.f32 %v1708_v16, 0.0 }
 0xd07   :  { %v3640_v37 = vpack.c.bf16 %v1717_v33, %v1716_v36 }
 0xd09   :  { %3641 = vmatprep.subr.bf16.mxu1 %v3640_v37 }
 0xd0a   :  { %3643 = vmatpush3.bf16.msra.mxu1 %v3640_v37 }
 0xd0d   :  { %3329 = vmatmul.mubr.msk.f32.vlgmr.msra.gmra.mrb[18].mxu1 %vm4772_vm5, %v4331_v31  ;;  %vm4782_vm5 = vmmov %vm4781_vm12 }
 0xd0e   :  { %3335 = vmatprep.mubr.msk.f32.mxu1 %vm4773_vm14, %v4338_v32  ;;  %vm4778_vm14 = vnez %v4753_v30 }
 0xde0   :  { %v3330_v46 = vpop.f32.mrb[18].mxu1 }
 0xde1   :  { %v1790_v48 = vadd.f32 %v3330_v46, %v4347_v35  ;;  %v1784_v49 = vpop.f32.mrb[19].mxu1 }
 0xde2   :  { %v1785_v53 = vadd.f32 %v1784_v49, %v4345_v34 }
 0xde3   :  { %v1794_v60 = vmax.f32 %v1790_v48, 0.0 }
 0xde4   :  { %v1793_v62 = vmax.f32 %v1785_v53, 0.0 }
 0xde6   :  { %v3644_v1 = vpack.c.bf16 %v1794_v60, %v1793_v62 }
 0xde8   :  { %3645 = vmatprep.subr.bf16.mxu1 %v3644_v1 }
 0xde9   :  { %3647 = vmatpush3.bf16.msra.mxu1 %v3644_v1 }
 0xdea   :  { %3652 = vmatprep.subr.msk.bf16.mxu1 %vm4037_vm6, %v3811_v52 }
 0xdec   :  { %3336 = vmatmul.mubr.msk.f32.vlgmr.msra.gmra.mrb[20].mxu1 %vm4774_vm0, %v4354_v41 }
 0xdf2   :  { %3654 = vmatpush3.bf16.xpose.msk.msra.mxu1 %vm4041_vm7, %v3811_v52  ;;  %vm4775_vm7 = vnez %v4745_v18 }
 0xdf3   :  { %3656 = vmatprep.subr.msk.bf16.mxu1 %vm4053_vm10, %v3811_v52 }
 0xdfa   :  { %3658 = vmatpush3.bf16.xpose.msk.msra.mxu1 %vm4062_vm13, %v3811_v52  ;;  %vm4776_vm13 = vnez %v4749_v24 }
 0xdfb   :  { %3660 = vmatprep.subr.msk.bf16.mxu1 %vm4071_vm1, %v3811_v52 }
 0xe02   :  { %3662 = vmatpush3.bf16.xpose.msk.msra.mxu1 %vm4080_vm4, %v3811_v52  ;;  %vm4777_vm4 = vnez %v4751_v27 }
 0xe03   :  { %3664 = vmatprep.subr.msk.bf16.mxu1 %vm4089_vm9, %v3811_v52 }
 0xe0a   :  { %3666 = vmatpush3.bf16.xpose.msk.msra.mxu1 %vm4760_vm8, %v3811_v52  ;;  %vm4779_vm8 = vmmov 0  }
 0xe0b   :  { %3668 = vmatprep.subr.msk.bf16.mxu1 %vm4107_vm3, %v3811_v52 }
 0xe12   :  { %3670 = vmatpush3.bf16.xpose.msk.msra.mxu1 %vm4761_vm15, %v3811_v52  ;;  %vm4780_vm15 = vcmp.eq.s32.totalorder %v4423_v19, %v4418_v17 }
 0xe13   :  { %3672 = vmatprep.subr.msk.bf16.mxu1 %vm4125_vm2, %v3811_v52 }
 0xe1a   :  { %3674 = vmatpush3.bf16.xpose.msk.msra.mxu1 %vm4775_vm7, %v3811_v52  ;;  %vm4783_vm7 = vmmov %vm4774_vm0 }
 0xe1b   :  { %3676 = vmatprep.subr.msk.bf16.mxu1 %vm4143_vm11, %v3811_v52 }
 0xe22   :  { %3678 = vmatpush3.bf16.xpose.msk.msra.mxu1 %vm4776_vm13, %v3811_v52  ;;  %vm4784_vm13 = vmmov %vm4774_vm0 }
 0xe23   :  { %3680 = vmatprep.subr.msk.bf16.mxu1 %vm4777_vm4, %v3811_v52 }
 0xe2a   :  { %3682 = vmatpush3.bf16.xpose.msk.msra.mxu1 %vm4778_vm14, %v3811_v52  ;;  %vm4785_vm14 = vmmov %vm4774_vm0 }
 0xe2b   :  { %3751 = vmatprep.subr.bf16.mxu1 %v3818_v42 }
 0xebf   :  { %v3337_v51 = vpop.f32.mrb[20].mxu1 }
 0xec0   :  { %v1867_v58 = vadd.f32 %v3337_v51, %v4408_v43  ;;  %v1861_v0 = vpop.f32.mrb[21].mxu1 }
 0xec1   :  { %v1862_v6 = vadd.f32 %v1861_v0, %v4410_v54 }
 0xec2   :  { %v1871_v12 = vmax.f32 %v1867_v58, 0.0 }
 0xec3   :  { %v1870_v18 = vmax.f32 %v1862_v6, 0.0 }
 0xec5   :  { %v4576_v24 = vpack.c.bf16 %v1871_v12, %v1870_v18  ;;  %3086 = vmatprep.mubr.f32.mxu1 %v1870_v18 }
 0xec6   :  { %3087 = vmatmul.mubr.f32.vlgmr.msra.gmra.mrb[22].mxu1 %v1870_v18 }
 0xec7   :  { %3650 = vmatpush3.bf16.xpose.msra.mxu0 %v4576_v24  ;;  %3088 = vmatprep.mubr.f32.mxu1 %v1871_v12 }
 0xeca   :  { %3089 = vmatmul.mubr.f32.gmra.mrb[24].mxu1 %v1871_v12 }
 0xecb   :  { %3438 = vmatprep.mubr.msk.f32.mxu1 %vm4779_vm8, %v3820_v20  ;;  %vm4793_vm8 = vmmov %vm4774_vm0 }
 0xece   :  { %3343 = vmatmul.mubr.msk.f32.vlgmr.msra.gmra.mrb[20].mxu0 %vm4780_vm15, %v3821_v22 }
 0xecf   :  { %3357 = vmatprep.mubr.msk.f32.mxu0 %vm4781_vm12, %v4182_v57 }
 0xf99   :  { %v2008_v30 = vpop.f32.mrb[22].mxu1 }
 0xf9a   :  { %v2010_v42 = vpop.f32.mrb[23].mxu1 }
 0xf9d   :  { %v2014_v4 = vpop.f32.mrb[24].mxu1 }
 0xf9e   :  { %v3683_v56 = vpack.c.bf16 %v2014_v4, %v2008_v30  ;;  %v2016_v14 = vpop.f32.mrb[25].mxu1 }
 0xf9f   :  { %v3687_v44 = vpack.c.bf16 %v2016_v14, %v2010_v42 }
 0xfa0   :  { %3684 = vmatprep.subr.bf16.mxu0 %v3683_v56 }
 0xfa1   :  { %v1938_v26 = vpop.f32.mrb[20].mxu0  ;;  %3686 = vmatpush3.bf16.msra.mxu0 %v3683_v56 }
 0xfa2   :  { %3688 = vmatprep.subr.bf16.mxu0 %v3687_v44  ;;  %2627 = vrot.lane.b32.xlu1 %v1938_v26, %s3822_s3  ;;  %v3344_v20 = vpop.f32.mrb[21].mxu0 }
 0xfa5   :  { %3690 = vmatpush3.bf16.msra.mxu0 %v3687_v44 }
 0xfa6   :  { %3692 = vmatprep.subr.bf16.mxu0 %v4506_v63 }
 0xfa9   :  { %3694 = vmatpush3.bf16.msra.mxu0 %v4506_v63 }
 0xfac   :  { %3358 = vmatmul.mubr.msk.f32.vlgmr.msra.gmra.mrb[22].mxu0 %vm4782_vm5, %v4191_v5 }
 0xfad   :  { %3364 = vmatprep.mubr.msk.f32.mxu0 %vm4774_vm0, %v4198_v7 }
0x107f   :  { %v3359_v57 = vpop.f32.mrb[22].mxu0 }
0x1080   :  { %v2091_v16 = vadd.f32 %v3359_v57, %v4204_v10  ;;  %v2085_v33 = vpop.f32.mrb[23].mxu0 }
0x1081   :  { %v2086_v36 = vadd.f32 %v2085_v33, %v4206_v11 }
0x1082   :  { %v2095_v37 = vmax.f32 %v2091_v16, 0.0 }
0x1083   :  { %v2094_v46 = vmax.f32 %v2086_v36, 0.0 }
0x1085   :  { %v3695_v48 = vpack.c.bf16 %v2095_v37, %v2094_v46 }
0x1087   :  { %3696 = vmatprep.subr.bf16.mxu0 %v3695_v48 }
0x1088   :  { %3698 = vmatpush3.bf16.msra.mxu0 %v3695_v48 }
0x108b   :  { %3365 = vmatmul.mubr.msk.f32.vlgmr.msra.gmra.mrb[24].mxu0 %vm4783_vm7, %v4213_v23 }
0x108c   :  { %3371 = vmatprep.mubr.msk.f32.mxu0 %vm4784_vm13, %v4220_v25 }
0x115e   :  { %v3366_v5 = vpop.f32.mrb[24].mxu0 }
0x115f   :  { %v2168_v7 = vadd.f32 %v3366_v5, %v4228_v29  ;;  %v2162_v63 = vpop.f32.mrb[25].mxu0 }
0x1160   :  { %v2163_v10 = vadd.f32 %v2162_v63, %v4226_v28 }
0x1161   :  { %v2172_v49 = vmax.f32 %v2168_v7, 0.0 }
0x1162   :  { %v2171_v53 = vmax.f32 %v2163_v10, 0.0 }
0x1164   :  { %v3699_v11 = vpack.c.bf16 %v2172_v49, %v2171_v53 }
0x1166   :  { %3700 = vmatprep.subr.bf16.mxu0 %v3699_v11 }
0x1167   :  { %3702 = vmatpush3.bf16.msra.mxu0 %v3699_v11 }
0x1168   :  { %3704 = vmatprep.subr.msk.bf16.mxu0 %vm4037_vm6, %v3811_v52 }
0x116a   :  { %3372 = vmatmul.mubr.msk.f32.vlgmr.msra.gmra.mrb[26].mxu0 %vm4785_vm14, %v4235_v38 }
0x116b   :  { %3706 = vmatpush3.bf16.msk.msra.mxu0 %vm4037_vm6, %v3811_v52  ;;  %vm4786_vm6 = vcmask 261120  }
0x116c   :  { %3708 = vmatprep.subr.msk.bf16.mxu0 %vm4053_vm10, %v3811_v52 }
0x116f   :  { %3710 = vmatpush3.bf16.msk.msra.mxu0 %vm4053_vm10, %v3811_v52  ;;  %vm4787_vm10 = vmmov %vm4786_vm6 }
0x1170   :  { %3712 = vmatprep.subr.msk.bf16.mxu0 %vm4071_vm1, %v3811_v52 }
0x1173   :  { %3714 = vmatpush3.bf16.msk.msra.mxu0 %vm4071_vm1, %v3811_v52  ;;  %vm4788_vm1 = vmmov %vm4774_vm0 }
0x1174   :  { %3716 = vmatprep.subr.msk.bf16.mxu0 %vm4089_vm9, %v3811_v52 }
0x1177   :  { %3718 = vmatpush3.bf16.msk.msra.mxu0 %vm4089_vm9, %v3811_v52  ;;  %vm4789_vm9 = vmmov %vm4774_vm0 }
0x1178   :  { %3720 = vmatprep.subr.msk.bf16.mxu0 %vm4107_vm3, %v3811_v52 }
0x117b   :  { %3722 = vmatpush3.bf16.msk.msra.mxu0 %vm4107_vm3, %v3811_v52  ;;  %vm4790_vm3 = vmmov %vm4774_vm0 }
0x117c   :  { %3724 = vmatprep.subr.msk.bf16.mxu0 %vm4125_vm2, %v3811_v52 }
0x117f   :  { %3726 = vmatpush3.bf16.msk.msra.mxu0 %vm4125_vm2, %v3811_v52  ;;  %vm4792_vm2 = vmmov %vm4780_vm15 }
0x1180   :  { %3728 = vmatprep.subr.msk.bf16.mxu0 %vm4143_vm11, %v3811_v52  ;;  %vm4794_vm15 = vmmov %vm4786_vm6 }
0x1183   :  { %3730 = vmatpush3.bf16.msk.msra.mxu0 %vm4143_vm11, %v3811_v52  ;;  %vm4791_vm11 = vmmov %vm4774_vm0 }
0x1184   :  { %3732 = vmatprep.subr.msk.bf16.mxu0 %vm4777_vm4, %v3811_v52 }
0x1187   :  { %3734 = vmatpush3.bf16.msk.msra.mxu0 %vm4777_vm4, %v3811_v52  ;;  %vm2636_vm4 = vcmask 386048  }
0x1188   :  { %3736 = vmatprep.subr.bf16.mxu0 %v4576_v24 }
0x123d   :  { %v3373_v50 = vpop.f32.mrb[26].mxu0 }
0x123e   :  { %v2245_v55 = vadd.f32 %v3373_v50, %v4288_v40  ;;  %v2239_v61 = vpop.f32.mrb[27].mxu0 }
0x123f   :  { %v2240_v3 = vadd.f32 %v2239_v61, %v4290_v45 }
0x1240   :  { %v2249_v15 = vmax.f32 %v2245_v55, 0.0 }
0x1241   :  { %v2248_v9 = vmax.f32 %v2240_v3, 0.0 }
0x1243   :  { %3406 = vmatprep.mubr.f32.mxu0 %v2248_v9 }
0x1244   :  { %3407 = vmatmul.mubr.f32.vlgmr.msra.gmra.mrb[28].mxu0 %v2249_v15 }
0x1245   :  { %3738 = vmatpush3.bf16.msra.mxu0 %v4576_v24  ;;  %3417 = vmatprep.mubr.msk.f32.mxu0 %vm4786_vm6, %v4300_v59 }
0x1317   :  { %v3408_v21 = vpop.f32.mrb[28].mxu0 }
0x1318   :  { %v2316_v27 = vpop.f32.mrb[29].mxu0 }
0x1319   :  { %v3739_v52 = vpack.c.bf16 %v3408_v21, %v2316_v27 }
0x131b   :  { %3740 = vmatprep.subr.bf16.mxu0 %v3739_v52 }
0x131c   :  { %3742 = vmatpush3.bf16.msra.mxu0 %v3739_v52 }
0x131f   :  { %3418 = vmatmul.mubr.msk.f32.vlgmr.msra.gmra.mrb[30].mxu0 %vm4787_vm10, %v4309_v39 }
0x1320   :  { %3424 = vmatprep.mubr.msk.f32.mxu0 %vm4788_vm1, %v4316_v2 }
0x13f2   :  { %v3419_v23 = vpop.f32.mrb[30].mxu0 }
0x13f3   :  { %v2397_v25 = vadd.f32 %v3419_v23, %v4322_v8  ;;  %v2391_v28 = vpop.f32.mrb[31].mxu0 }
0x13f4   :  { %v2392_v29 = vadd.f32 %v2391_v28, %v4324_v13 }
0x13f5   :  { %v2401_v38 = vmax.f32 %v2397_v25, 0.0 }
0x13f6   :  { %v2400_v40 = vmax.f32 %v2392_v29, 0.0 }
0x13f8   :  { %v3743_v45 = vpack.c.bf16 %v2401_v38, %v2400_v40 }
0x13fa   :  { %3744 = vmatprep.subr.bf16.mxu0 %v3743_v45 }
0x13fb   :  { %3746 = vmatpush3.bf16.msra.mxu0 %v3743_v45 }
0x13fe   :  { %3425 = vmatmul.mubr.msk.f32.vlgmr.msra.gmra.mrb[32].mxu0 %vm4789_vm9, %v4331_v31 }
0x13ff   :  { %3431 = vmatprep.mubr.msk.f32.mxu0 %vm4790_vm3, %v4338_v32 }
0x14d1   :  { %v3426_v59 = vpop.f32.mrb[32].mxu0 }
0x14d2   :  { %v2474_v39 = vadd.f32 %v3426_v59, %v4347_v35  ;;  %v2468_v2 = vpop.f32.mrb[33].mxu0 }
0x14d3   :  { %v2469_v8 = vadd.f32 %v2468_v2, %v4345_v34 }
0x14d4   :  { %v2478_v60 = vmax.f32 %v2474_v39, 0.0 }
0x14d5   :  { %v2477_v62 = vmax.f32 %v2469_v8, 0.0 }
0x14d7   :  { %v3747_v13 = vpack.c.bf16 %v2478_v60, %v2477_v62 }
0x14d9   :  { %3748 = vmatprep.subr.bf16.mxu0 %v3747_v13 }
0x14da   :  { %3750 = vmatpush3.bf16.msra.mxu0 %v3747_v13 }
0x14dd   :  { %3432 = vmatmul.mubr.msk.f32.vlgmr.msra.gmra.mrb[34].mxu0 %vm4791_vm11, %v4354_v41  ;;  %v2628_v41 = vpop.permute.xlu1 %2627 }
0x15b0   :  { %v3433_v1 = vpop.f32.mrb[34].mxu0 }
0x15b1   :  { %v2551_v31 = vadd.f32 %v3433_v1, %v4408_v43  ;;  %v2545_v51 = vpop.f32.mrb[35].mxu0  ;;  %v2634_v43 = vsel %vm4793_vm8, %v4443_v47, %v2628_v41 }
0x15b2   :  { %v2546_v32 = vadd.f32 %v2545_v51, %v4410_v54 }
0x15b3   :  { %v2555_v58 = vmax.f32 %v2551_v31, 0.0 }
0x15b4   :  { %v2554_v0 = vmax.f32 %v2546_v32, 0.0 }
0x15b6   :  { %v3752_v35 = vpack.c.bf16 %v2555_v58, %v2554_v0 }
0x15b8   :  { %3753 = vmatpush3.bf16.xpose.msra.mxu1 %v3752_v35 }
0x15bf   :  { %3439 = vmatmul.mubr.msk.f32.vlgmr.msra.gmra.mrb[26].mxu1 %vm4792_vm2, %v3821_v22 }
0x1692   :  { %v2622_v34 = vpop.f32.mrb[26].mxu1 }
0x1693   :  { %2631 = vrot.lane.b32.xlu0 %v2622_v34, %s3823_s23  ;;  %v3440_v6 = vpop.f32.mrb[27].mxu1 }
0x1705   :  { %v2632_v54 = vpop.permute.xlu0 %2631 }
0x1706   :  { %v2635_v12 = vsel %vm4794_vm15, %v2634_v43, %v2632_v54 }
0x1707   :  { %2637 = vst.msk [vmem:[#allocation2] sm:$0x3] %vm2636_vm4, %v2635_v12 }
0x1708   :  { %3796 = shalt.err (!%p3793_p4)
}
0x1709   :  { %s3797_s27 = scalar_lea.hbm %s4705_s13, 32 }
0x170a   :  { %p3798_p5 = scmp.ne.s32.totalorder %s4705_s13, %s3797_s27  ;;  %p3801_p6 = scmp.lt.u32.totalorder %s3797_s27, %s4705_s13 }
0x170c   :  { %p3803_p7 = pnand %p3801_p6, %p3798_p5 }
0x170e   :  { %3806 = shalt.err (!%p3803_p7)
}
0x170f   :  { %2647 = dma.vmem_to_hbm [thread:$0]  %s2645_s25, 32, %s4705_s13, [#allocation3]  }
0x1710   :  { %3807 = dma.done.wait [#allocation3], 32  }
0x1711   :  { %3808 = vsyncadd [#allocation3], 4294967264 }
0x1712   :  { %2651 = vsyncpa [#allocation3], 1 }

</bundles_post_ra>
